<compile_context>
chip_gen: v7x
topology: tpu7x:2x2x1
jax: 0.10.0
libtpu: 0.0.40
codegen_flags: <defaults>
</compile_context>

<pallas_src>
import functools

import jax
import jax.numpy as jnp
import numpy as np
from jax import lax
from jax.experimental import pallas as pl
from jax.experimental.pallas import tpu as pltpu


def _sine_lstm_kernel(x_ref, wih_ref, whh_ref, b_ref, wlin_ref, blin_ref,
                      out_ref, xproj_ref, *, seq_len, hp):
    # x_ref:     (T, 1)       VMEM  input sequence (column vector)
    # wih_ref:   (1, 4*HP)    VMEM  input->gate weights, gate order (i, f, o, g)
    # whh_ref:   (HP, 4*HP)   VMEM  hidden->gate weights, packed & pre-transposed
    # b_ref:     (1, 4*HP)    VMEM  b_ih + b_hh, same gate order
    # wlin_ref:  (HP, 1)      VMEM  final linear weight, pre-transposed
    # blin_ref:  (1, 1)       VMEM  final linear bias
    # out_ref:   (1, 1)       VMEM  prediction at the last time step
    # xproj_ref: (T, 4*HP)    VMEM scratch: hoisted input projection + bias
    HP = hp

    # Hoisted, fully parallel over T (uses all sublanes; off the critical path).
    xproj_ref[...] = x_ref[...] * wih_ref[...] + b_ref[...]          # (T, 4*HP)

    whh = whh_ref[...]                                               # (HP, 4*HP)

    def step(t, carry):
        h, c = carry
        # Single fused matvec for all four gates.
        pre = xproj_ref[pl.ds(t, 1), :] + jnp.dot(
            h, whh, preferred_element_type=jnp.float32)              # (1, 4*HP)
        sig = jax.nn.sigmoid(pre[:, : 3 * HP])                       # i | f | o
        g_g = jnp.tanh(pre[:, 3 * HP:])                              # g
        i_g = sig[:, :HP]
        f_g = sig[:, HP:2 * HP]
        o_g = sig[:, 2 * HP:3 * HP]
        c_new = f_g * c + i_g * g_g
        h_new = o_g * jnp.tanh(c_new)
        return (h_new, c_new)

    h0 = jnp.zeros((1, HP), jnp.float32)
    c0 = jnp.zeros((1, HP), jnp.float32)
    # TODO(synk): weight-stationary MXU (pltpu.matmul_push_rhs/acc_lhs/pop) could
    # further amortize the per-step Whh streaming; kept on jnp.dot for robustness.
    h_last, _ = lax.fori_loop(0, seq_len, step, (h0, c0), unroll=True)

    out_ref[...] = (jnp.dot(h_last, wlin_ref[...],
                            preferred_element_type=jnp.float32)
                    + blin_ref[...])


def init_params(key, hidden_size=50, input_size=1, output_size=1):
    """Deterministic init mirroring PyTorch's parameter shapes / uniform(-k, k)."""
    h = hidden_size
    k = 1.0 / np.sqrt(h)
    ks = jax.random.split(key, 6)
    u = lambda kk, shape: jax.random.uniform(kk, shape, jnp.float32, -k, k)
    return {
        "weight_ih": u(ks[0], (4 * h, input_size)),   # (4H, 1), gate order i,f,g,o
        "weight_hh": u(ks[1], (4 * h, h)),            # (4H, H)
        "bias_ih":   u(ks[2], (4 * h,)),
        "bias_hh":   u(ks[3], (4 * h,)),
        "lin_w":     u(ks[4], (output_size, h)),      # (1, H)
        "lin_b":     u(ks[5], (output_size,)),        # (1,)
    }


def sine_wave_lstm_forward(input_seq, params, hidden_size=50):
    """input_seq: (T, 1, 1) float32, seq-major like nn.LSTM. Returns shape (1,)."""
    T = int(input_seq.shape[0])
    H = hidden_size
    HP = 128                     # hidden dim padded to one full lane tile
    G4 = 4 * HP                  # fused gate width

    # PyTorch gate order is (i, f, g, o); reorder to (i, f, o, g) so the three
    # sigmoid gates are contiguous lanes and tanh gets the last HP lanes.
    order = jnp.array([0, 1, 3, 2], dtype=jnp.int32)

    def pad_h(a):                # pad last dim H -> HP with zeros
        return jnp.pad(a, [(0, 0)] * (a.ndim - 1) + [(0, HP - H)])

    wih_g = pad_h(params["weight_ih"].reshape(4, H)[order])             # (4, HP)
    whh_g = pad_h(jnp.transpose(
        params["weight_hh"].reshape(4, H, H)[order], (0, 2, 1)))        # (4, H, HP)
    whh_g = jnp.pad(whh_g, ((0, 0), (0, HP - H), (0, 0)))               # (4, HP, HP)
    b_g = pad_h((params["bias_ih"] + params["bias_hh"]).reshape(4, H)[order])

    wih_cat = wih_g.reshape(1, G4)                                      # (1, 4*HP)
    whh_cat = jnp.transpose(whh_g, (1, 0, 2)).reshape(HP, G4)           # (HP, 4*HP)
    b_cat = b_g.reshape(1, G4)                                          # (1, 4*HP)
    wlin_p = jnp.pad(params["lin_w"].T, ((0, HP - H), (0, 0)))          # (HP, 1)
    blin_p = params["lin_b"].reshape(1, 1)                              # (1, 1)

    x2d = input_seq.reshape(T, 1).astype(jnp.float32)                   # (T, 1)

    out = pl.pallas_call(
        functools.partial(_sine_lstm_kernel, seq_len=T, hp=HP),
        out_shape=jax.ShapeDtypeStruct((1, 1), jnp.float32),
        in_specs=[
            pl.BlockSpec(memory_space=pltpu.MemorySpace.VMEM),   # x
            pl.BlockSpec(memory_space=pltpu.MemorySpace.VMEM),   # wih_cat
            pl.BlockSpec(memory_space=pltpu.MemorySpace.VMEM),   # whh_cat
            pl.BlockSpec(memory_space=pltpu.MemorySpace.VMEM),   # b_cat
            pl.BlockSpec(memory_space=pltpu.MemorySpace.VMEM),   # wlin
            pl.BlockSpec(memory_space=pltpu.MemorySpace.VMEM),   # blin
        ],
        out_specs=pl.BlockSpec(memory_space=pltpu.MemorySpace.VMEM),
        scratch_shapes=[pltpu.VMEM((T, G4), jnp.float32)],       # xproj
    )(x2d, wih_cat, whh_cat, b_cat, wlin_p, blin_p)

    return out.reshape(1)  # matches predictions[-1] shape (output_size,) = (1,)


def reference_forward(input_seq, params, hidden_size=50):
    """Pure-JAX reference of the PyTorch forward (first call, zero initial state)."""
    T = input_seq.shape[0]
    H = hidden_size
    x = input_seq.reshape(T, 1)                      # batch=1 squeezed -> (T, input)
    w_ih, w_hh = params["weight_ih"], params["weight_hh"]
    b = params["bias_ih"] + params["bias_hh"]

    def step(carry, x_t):
        h, c = carry
        gates = x_t @ w_ih.T + h @ w_hh.T + b        # (1, 4H)
        i, f, g, o = jnp.split(gates, 4, axis=-1)
        c = jax.nn.sigmoid(f) * c + jax.nn.sigmoid(i) * jnp.tanh(g)
        h = jax.nn.sigmoid(o) * jnp.tanh(c)
        return (h, c), h

    (h_last, _), _ = lax.scan(step, (jnp.zeros((1, H)), jnp.zeros((1, H))),
                              x[:, None, :])
    pred = h_last @ params["lin_w"].T + params["lin_b"]
    return pred.reshape(1)


if __name__ == "__main__":
    T = 8
    H = 50  # module default hidden_layer_size
    key = jax.random.PRNGKey(0)
    k_in, k_par = jax.random.split(key)

    # Deterministic "sine-like" input sequence, shape (T, batch=1, input_size=1).
    phase = jax.random.uniform(k_in, (), jnp.float32, 0.0, 2.0 * np.pi)
    input_seq = jnp.sin(phase + 0.3 * jnp.arange(T, dtype=jnp.float32)).reshape(T, 1, 1)

    params = init_params(k_par, hidden_size=H)

    out = sine_wave_lstm_forward(input_seq, params, hidden_size=H)
    out = jax.block_until_ready(out)

    ref = jax.block_until_ready(reference_forward(input_seq, params, hidden_size=H))
    assert out.shape == (1,)
    assert np.allclose(np.asarray(out), np.asarray(ref), rtol=1e-5, atol=1e-5), (out, ref)

    print("KERNEL_OK")
</pallas_src>

<mosaic_0001>
module attributes {stable_mosaic.version = 11 : i64} {
  func.func @_sine_lstm_kernel(%arg0: memref<8x1xf32, #tpu.memory_space<vmem>>, %arg1: memref<1x512xf32, #tpu.memory_space<vmem>>, %arg2: memref<128x512xf32, #tpu.memory_space<vmem>>, %arg3: memref<1x512xf32, #tpu.memory_space<vmem>>, %arg4: memref<128x1xf32, #tpu.memory_space<vmem>>, %arg5: memref<1x1xf32, #tpu.memory_space<vmem>>, %arg6: memref<1x1xf32, #tpu.memory_space<vmem>>, %arg7: memref<8x512xf32, #tpu.memory_space<vmem>>) attributes {dimension_semantics = [], scalar_prefetch = 0 : i64, scratch_operands = 1 : i64, tpu.core_type = #tpu.core_type<tc>} {
    %c0 = arith.constant 0 : index
    %c0_0 = arith.constant 0 : index
    %0 = vector.load %arg0[%c0, %c0_0] : memref<8x1xf32, #tpu.memory_space<vmem>>, vector<8x1xf32>
    %c0_1 = arith.constant 0 : index
    %c0_2 = arith.constant 0 : index
    %1 = vector.load %arg1[%c0_1, %c0_2] : memref<1x512xf32, #tpu.memory_space<vmem>>, vector<1x512xf32>
    %2 = vector.broadcast %0 : vector<8x1xf32> to vector<8x512xf32>
    %3 = vector.broadcast %1 : vector<1x512xf32> to vector<8x512xf32>
    %4 = arith.mulf %2, %3 : vector<8x512xf32>
    %c0_3 = arith.constant 0 : index
    %c0_4 = arith.constant 0 : index
    %5 = vector.load %arg3[%c0_3, %c0_4] : memref<1x512xf32, #tpu.memory_space<vmem>>, vector<1x512xf32>
    %6 = vector.broadcast %5 : vector<1x512xf32> to vector<8x512xf32>
    %7 = arith.addf %4, %6 : vector<8x512xf32>
    %c0_5 = arith.constant 0 : index
    %c0_6 = arith.constant 0 : index
    %8 = vector.load %arg7[%c0_5, %c0_6] : memref<8x512xf32, #tpu.memory_space<vmem>>, vector<8x512xf32>
    tpu.vector_store %arg7[%c0_5, %c0_6], %7 {strides = array<i32>} : memref<8x512xf32, #tpu.memory_space<vmem>>, vector<8x512xf32>,
    %c0_7 = arith.constant 0 : index
    %c0_8 = arith.constant 0 : index
    %9 = vector.load %arg2[%c0_7, %c0_8] : memref<128x512xf32, #tpu.memory_space<vmem>>, vector<128x512xf32>
    %cst = arith.constant 0.000000e+00 : f32
    %10 = vector.broadcast %cst : f32 to vector<1x128xf32>
    %cst_9 = arith.constant 0.000000e+00 : f32
    %11 = vector.broadcast %cst_9 : f32 to vector<1x128xf32>
    %c0_i32 = arith.constant 0 : i32
    %12 = arith.index_cast %c0_i32 : i32 to index
    %c0_10 = arith.constant 0 : index
    %13 = vector.load %arg7[%12, %c0_10] : memref<8x512xf32, #tpu.memory_space<vmem>>, vector<1x512xf32>
    %cst_11 = arith.constant dense<0.000000e+00> : vector<1x512xf32>
    %14 = tpu.matmul %10, %9, %cst_11 {dimension_numbers = #tpu.dot_dimension_numbers<[1], [0], [0], [1], [0, 0, 1, 1], [], []>} : vector<1x128xf32>, vector<128x512xf32>, vector<1x512xf32> -> vector<1x512xf32>
    %15 = arith.addf %13, %14 : vector<1x512xf32>
    %16 = vector.extract_strided_slice %15 {offsets = [0, 0], sizes = [1, 384], strides = [1, 1]} : vector<1x512xf32> to vector<1x384xf32>
    %17 = arith.negf %16 : vector<1x384xf32>
    %18 = math.exp %17 : vector<1x384xf32>
    %cst_12 = arith.constant 1.000000e+00 : f32
    %19 = vector.broadcast %cst_12 : f32 to vector<1x384xf32>
    %20 = arith.addf %19, %18 : vector<1x384xf32>
    %21 = arith.divf %19, %20 : vector<1x384xf32>
    %22 = vector.extract_strided_slice %15 {offsets = [0, 384], sizes = [1, 128], strides = [1, 1]} : vector<1x512xf32> to vector<1x128xf32>
    %23 = math.tanh %22 : vector<1x128xf32>
    %24 = vector.extract_strided_slice %21 {offsets = [0, 0], sizes = [1, 128], strides = [1, 1]} : vector<1x384xf32> to vector<1x128xf32>
    %25 = vector.extract_strided_slice %21 {offsets = [0, 128], sizes = [1, 128], strides = [1, 1]} : vector<1x384xf32> to vector<1x128xf32>
    %26 = vector.extract_strided_slice %21 {offsets = [0, 256], sizes = [1, 128], strides = [1, 1]} : vector<1x384xf32> to vector<1x128xf32>
    %27 = arith.mulf %25, %11 : vector<1x128xf32>
    %28 = arith.mulf %24, %23 : vector<1x128xf32>
    %29 = arith.addf %27, %28 : vector<1x128xf32>
    %30 = math.tanh %29 : vector<1x128xf32>
    %31 = arith.mulf %26, %30 : vector<1x128xf32>
    %c1_i32 = arith.constant 1 : i32
    %32 = arith.index_cast %c1_i32 : i32 to index
    %c0_13 = arith.constant 0 : index
    %33 = vector.load %arg7[%32, %c0_13] : memref<8x512xf32, #tpu.memory_space<vmem>>, vector<1x512xf32>
    %cst_14 = arith.constant dense<0.000000e+00> : vector<1x512xf32>
    %34 = tpu.matmul %31, %9, %cst_14 {dimension_numbers = #tpu.dot_dimension_numbers<[1], [0], [0], [1], [0, 0, 1, 1], [], []>} : vector<1x128xf32>, vector<128x512xf32>, vector<1x512xf32> -> vector<1x512xf32>
    %35 = arith.addf %33, %34 : vector<1x512xf32>
    %36 = vector.extract_strided_slice %35 {offsets = [0, 0], sizes = [1, 384], strides = [1, 1]} : vector<1x512xf32> to vector<1x384xf32>
    %37 = arith.negf %36 : vector<1x384xf32>
    %38 = math.exp %37 : vector<1x384xf32>
    %cst_15 = arith.constant 1.000000e+00 : f32
    %39 = vector.broadcast %cst_15 : f32 to vector<1x384xf32>
    %40 = arith.addf %39, %38 : vector<1x384xf32>
    %41 = arith.divf %39, %40 : vector<1x384xf32>
    %42 = vector.extract_strided_slice %35 {offsets = [0, 384], sizes = [1, 128], strides = [1, 1]} : vector<1x512xf32> to vector<1x128xf32>
    %43 = math.tanh %42 : vector<1x128xf32>
    %44 = vector.extract_strided_slice %41 {offsets = [0, 0], sizes = [1, 128], strides = [1, 1]} : vector<1x384xf32> to vector<1x128xf32>
    %45 = vector.extract_strided_slice %41 {offsets = [0, 128], sizes = [1, 128], strides = [1, 1]} : vector<1x384xf32> to vector<1x128xf32>
    %46 = vector.extract_strided_slice %41 {offsets = [0, 256], sizes = [1, 128], strides = [1, 1]} : vector<1x384xf32> to vector<1x128xf32>
    %47 = arith.mulf %45, %29 : vector<1x128xf32>
    %48 = arith.mulf %44, %43 : vector<1x128xf32>
    %49 = arith.addf %47, %48 : vector<1x128xf32>
    %50 = math.tanh %49 : vector<1x128xf32>
    %51 = arith.mulf %46, %50 : vector<1x128xf32>
    %c2_i32 = arith.constant 2 : i32
    %52 = arith.index_cast %c2_i32 : i32 to index
    %c0_16 = arith.constant 0 : index
    %53 = vector.load %arg7[%52, %c0_16] : memref<8x512xf32, #tpu.memory_space<vmem>>, vector<1x512xf32>
    %cst_17 = arith.constant dense<0.000000e+00> : vector<1x512xf32>
    %54 = tpu.matmul %51, %9, %cst_17 {dimension_numbers = #tpu.dot_dimension_numbers<[1], [0], [0], [1], [0, 0, 1, 1], [], []>} : vector<1x128xf32>, vector<128x512xf32>, vector<1x512xf32> -> vector<1x512xf32>
    %55 = arith.addf %53, %54 : vector<1x512xf32>
    %56 = vector.extract_strided_slice %55 {offsets = [0, 0], sizes = [1, 384], strides = [1, 1]} : vector<1x512xf32> to vector<1x384xf32>
    %57 = arith.negf %56 : vector<1x384xf32>
    %58 = math.exp %57 : vector<1x384xf32>
    %cst_18 = arith.constant 1.000000e+00 : f32
    %59 = vector.broadcast %cst_18 : f32 to vector<1x384xf32>
    %60 = arith.addf %59, %58 : vector<1x384xf32>
    %61 = arith.divf %59, %60 : vector<1x384xf32>
    %62 = vector.extract_strided_slice %55 {offsets = [0, 384], sizes = [1, 128], strides = [1, 1]} : vector<1x512xf32> to vector<1x128xf32>
    %63 = math.tanh %62 : vector<1x128xf32>
    %64 = vector.extract_strided_slice %61 {offsets = [0, 0], sizes = [1, 128], strides = [1, 1]} : vector<1x384xf32> to vector<1x128xf32>
    %65 = vector.extract_strided_slice %61 {offsets = [0, 128], sizes = [1, 128], strides = [1, 1]} : vector<1x384xf32> to vector<1x128xf32>
    %66 = vector.extract_strided_slice %61 {offsets = [0, 256], sizes = [1, 128], strides = [1, 1]} : vector<1x384xf32> to vector<1x128xf32>
    %67 = arith.mulf %65, %49 : vector<1x128xf32>
    %68 = arith.mulf %64, %63 : vector<1x128xf32>
    %69 = arith.addf %67, %68 : vector<1x128xf32>
    %70 = math.tanh %69 : vector<1x128xf32>
    %71 = arith.mulf %66, %70 : vector<1x128xf32>
    %c3_i32 = arith.constant 3 : i32
    %72 = arith.index_cast %c3_i32 : i32 to index
    %c0_19 = arith.constant 0 : index
    %73 = vector.load %arg7[%72, %c0_19] : memref<8x512xf32, #tpu.memory_space<vmem>>, vector<1x512xf32>
    %cst_20 = arith.constant dense<0.000000e+00> : vector<1x512xf32>
    %74 = tpu.matmul %71, %9, %cst_20 {dimension_numbers = #tpu.dot_dimension_numbers<[1], [0], [0], [1], [0, 0, 1, 1], [], []>} : vector<1x128xf32>, vector<128x512xf32>, vector<1x512xf32> -> vector<1x512xf32>
    %75 = arith.addf %73, %74 : vector<1x512xf32>
    %76 = vector.extract_strided_slice %75 {offsets = [0, 0], sizes = [1, 384], strides = [1, 1]} : vector<1x512xf32> to vector<1x384xf32>
    %77 = arith.negf %76 : vector<1x384xf32>
    %78 = math.exp %77 : vector<1x384xf32>
    %cst_21 = arith.constant 1.000000e+00 : f32
    %79 = vector.broadcast %cst_21 : f32 to vector<1x384xf32>
    %80 = arith.addf %79, %78 : vector<1x384xf32>
    %81 = arith.divf %79, %80 : vector<1x384xf32>
    %82 = vector.extract_strided_slice %75 {offsets = [0, 384], sizes = [1, 128], strides = [1, 1]} : vector<1x512xf32> to vector<1x128xf32>
    %83 = math.tanh %82 : vector<1x128xf32>
    %84 = vector.extract_strided_slice %81 {offsets = [0, 0], sizes = [1, 128], strides = [1, 1]} : vector<1x384xf32> to vector<1x128xf32>
    %85 = vector.extract_strided_slice %81 {offsets = [0, 128], sizes = [1, 128], strides = [1, 1]} : vector<1x384xf32> to vector<1x128xf32>
    %86 = vector.extract_strided_slice %81 {offsets = [0, 256], sizes = [1, 128], strides = [1, 1]} : vector<1x384xf32> to vector<1x128xf32>
    %87 = arith.mulf %85, %69 : vector<1x128xf32>
    %88 = arith.mulf %84, %83 : vector<1x128xf32>
    %89 = arith.addf %87, %88 : vector<1x128xf32>
    %90 = math.tanh %89 : vector<1x128xf32>
    %91 = arith.mulf %86, %90 : vector<1x128xf32>
    %c4_i32 = arith.constant 4 : i32
    %92 = arith.index_cast %c4_i32 : i32 to index
    %c0_22 = arith.constant 0 : index
    %93 = vector.load %arg7[%92, %c0_22] : memref<8x512xf32, #tpu.memory_space<vmem>>, vector<1x512xf32>
    %cst_23 = arith.constant dense<0.000000e+00> : vector<1x512xf32>
    %94 = tpu.matmul %91, %9, %cst_23 {dimension_numbers = #tpu.dot_dimension_numbers<[1], [0], [0], [1], [0, 0, 1, 1], [], []>} : vector<1x128xf32>, vector<128x512xf32>, vector<1x512xf32> -> vector<1x512xf32>
    %95 = arith.addf %93, %94 : vector<1x512xf32>
    %96 = vector.extract_strided_slice %95 {offsets = [0, 0], sizes = [1, 384], strides = [1, 1]} : vector<1x512xf32> to vector<1x384xf32>
    %97 = arith.negf %96 : vector<1x384xf32>
    %98 = math.exp %97 : vector<1x384xf32>
    %cst_24 = arith.constant 1.000000e+00 : f32
    %99 = vector.broadcast %cst_24 : f32 to vector<1x384xf32>
    %100 = arith.addf %99, %98 : vector<1x384xf32>
    %101 = arith.divf %99, %100 : vector<1x384xf32>
    %102 = vector.extract_strided_slice %95 {offsets = [0, 384], sizes = [1, 128], strides = [1, 1]} : vector<1x512xf32> to vector<1x128xf32>
    %103 = math.tanh %102 : vector<1x128xf32>
    %104 = vector.extract_strided_slice %101 {offsets = [0, 0], sizes = [1, 128], strides = [1, 1]} : vector<1x384xf32> to vector<1x128xf32>
    %105 = vector.extract_strided_slice %101 {offsets = [0, 128], sizes = [1, 128], strides = [1, 1]} : vector<1x384xf32> to vector<1x128xf32>
    %106 = vector.extract_strided_slice %101 {offsets = [0, 256], sizes = [1, 128], strides = [1, 1]} : vector<1x384xf32> to vector<1x128xf32>
    %107 = arith.mulf %105, %89 : vector<1x128xf32>
    %108 = arith.mulf %104, %103 : vector<1x128xf32>
    %109 = arith.addf %107, %108 : vector<1x128xf32>
    %110 = math.tanh %109 : vector<1x128xf32>
    %111 = arith.mulf %106, %110 : vector<1x128xf32>
    %c5_i32 = arith.constant 5 : i32
    %112 = arith.index_cast %c5_i32 : i32 to index
    %c0_25 = arith.constant 0 : index
    %113 = vector.load %arg7[%112, %c0_25] : memref<8x512xf32, #tpu.memory_space<vmem>>, vector<1x512xf32>
    %cst_26 = arith.constant dense<0.000000e+00> : vector<1x512xf32>
    %114 = tpu.matmul %111, %9, %cst_26 {dimension_numbers = #tpu.dot_dimension_numbers<[1], [0], [0], [1], [0, 0, 1, 1], [], []>} : vector<1x128xf32>, vector<128x512xf32>, vector<1x512xf32> -> vector<1x512xf32>
    %115 = arith.addf %113, %114 : vector<1x512xf32>
    %116 = vector.extract_strided_slice %115 {offsets = [0, 0], sizes = [1, 384], strides = [1, 1]} : vector<1x512xf32> to vector<1x384xf32>
    %117 = arith.negf %116 : vector<1x384xf32>
    %118 = math.exp %117 : vector<1x384xf32>
    %cst_27 = arith.constant 1.000000e+00 : f32
    %119 = vector.broadcast %cst_27 : f32 to vector<1x384xf32>
    %120 = arith.addf %119, %118 : vector<1x384xf32>
    %121 = arith.divf %119, %120 : vector<1x384xf32>
    %122 = vector.extract_strided_slice %115 {offsets = [0, 384], sizes = [1, 128], strides = [1, 1]} : vector<1x512xf32> to vector<1x128xf32>
    %123 = math.tanh %122 : vector<1x128xf32>
    %124 = vector.extract_strided_slice %121 {offsets = [0, 0], sizes = [1, 128], strides = [1, 1]} : vector<1x384xf32> to vector<1x128xf32>
    %125 = vector.extract_strided_slice %121 {offsets = [0, 128], sizes = [1, 128], strides = [1, 1]} : vector<1x384xf32> to vector<1x128xf32>
    %126 = vector.extract_strided_slice %121 {offsets = [0, 256], sizes = [1, 128], strides = [1, 1]} : vector<1x384xf32> to vector<1x128xf32>
    %127 = arith.mulf %125, %109 : vector<1x128xf32>
    %128 = arith.mulf %124, %123 : vector<1x128xf32>
    %129 = arith.addf %127, %128 : vector<1x128xf32>
    %130 = math.tanh %129 : vector<1x128xf32>
    %131 = arith.mulf %126, %130 : vector<1x128xf32>
    %c6_i32 = arith.constant 6 : i32
    %132 = arith.index_cast %c6_i32 : i32 to index
    %c0_28 = arith.constant 0 : index
    %133 = vector.load %arg7[%132, %c0_28] : memref<8x512xf32, #tpu.memory_space<vmem>>, vector<1x512xf32>
    %cst_29 = arith.constant dense<0.000000e+00> : vector<1x512xf32>
    %134 = tpu.matmul %131, %9, %cst_29 {dimension_numbers = #tpu.dot_dimension_numbers<[1], [0], [0], [1], [0, 0, 1, 1], [], []>} : vector<1x128xf32>, vector<128x512xf32>, vector<1x512xf32> -> vector<1x512xf32>
    %135 = arith.addf %133, %134 : vector<1x512xf32>
    %136 = vector.extract_strided_slice %135 {offsets = [0, 0], sizes = [1, 384], strides = [1, 1]} : vector<1x512xf32> to vector<1x384xf32>
    %137 = arith.negf %136 : vector<1x384xf32>
    %138 = math.exp %137 : vector<1x384xf32>
    %cst_30 = arith.constant 1.000000e+00 : f32
    %139 = vector.broadcast %cst_30 : f32 to vector<1x384xf32>
    %140 = arith.addf %139, %138 : vector<1x384xf32>
    %141 = arith.divf %139, %140 : vector<1x384xf32>
    %142 = vector.extract_strided_slice %135 {offsets = [0, 384], sizes = [1, 128], strides = [1, 1]} : vector<1x512xf32> to vector<1x128xf32>
    %143 = math.tanh %142 : vector<1x128xf32>
    %144 = vector.extract_strided_slice %141 {offsets = [0, 0], sizes = [1, 128], strides = [1, 1]} : vector<1x384xf32> to vector<1x128xf32>
    %145 = vector.extract_strided_slice %141 {offsets = [0, 128], sizes = [1, 128], strides = [1, 1]} : vector<1x384xf32> to vector<1x128xf32>
    %146 = vector.extract_strided_slice %141 {offsets = [0, 256], sizes = [1, 128], strides = [1, 1]} : vector<1x384xf32> to vector<1x128xf32>
    %147 = arith.mulf %145, %129 : vector<1x128xf32>
    %148 = arith.mulf %144, %143 : vector<1x128xf32>
    %149 = arith.addf %147, %148 : vector<1x128xf32>
    %150 = math.tanh %149 : vector<1x128xf32>
    %151 = arith.mulf %146, %150 : vector<1x128xf32>
    %c7_i32 = arith.constant 7 : i32
    %152 = arith.index_cast %c7_i32 : i32 to index
    %c0_31 = arith.constant 0 : index
    %153 = vector.load %arg7[%152, %c0_31] : memref<8x512xf32, #tpu.memory_space<vmem>>, vector<1x512xf32>
    %cst_32 = arith.constant dense<0.000000e+00> : vector<1x512xf32>
    %154 = tpu.matmul %151, %9, %cst_32 {dimension_numbers = #tpu.dot_dimension_numbers<[1], [0], [0], [1], [0, 0, 1, 1], [], []>} : vector<1x128xf32>, vector<128x512xf32>, vector<1x512xf32> -> vector<1x512xf32>
    %155 = arith.addf %153, %154 : vector<1x512xf32>
    %156 = vector.extract_strided_slice %155 {offsets = [0, 0], sizes = [1, 384], strides = [1, 1]} : vector<1x512xf32> to vector<1x384xf32>
    %157 = arith.negf %156 : vector<1x384xf32>
    %158 = math.exp %157 : vector<1x384xf32>
    %cst_33 = arith.constant 1.000000e+00 : f32
    %159 = vector.broadcast %cst_33 : f32 to vector<1x384xf32>
    %160 = arith.addf %159, %158 : vector<1x384xf32>
    %161 = arith.divf %159, %160 : vector<1x384xf32>
    %162 = vector.extract_strided_slice %155 {offsets = [0, 384], sizes = [1, 128], strides = [1, 1]} : vector<1x512xf32> to vector<1x128xf32>
    %163 = math.tanh %162 : vector<1x128xf32>
    %164 = vector.extract_strided_slice %161 {offsets = [0, 0], sizes = [1, 128], strides = [1, 1]} : vector<1x384xf32> to vector<1x128xf32>
    %165 = vector.extract_strided_slice %161 {offsets = [0, 128], sizes = [1, 128], strides = [1, 1]} : vector<1x384xf32> to vector<1x128xf32>
    %166 = vector.extract_strided_slice %161 {offsets = [0, 256], sizes = [1, 128], strides = [1, 1]} : vector<1x384xf32> to vector<1x128xf32>
    %167 = arith.mulf %165, %149 : vector<1x128xf32>
    %168 = arith.mulf %164, %163 : vector<1x128xf32>
    %169 = arith.addf %167, %168 : vector<1x128xf32>
    %170 = math.tanh %169 : vector<1x128xf32>
    %171 = arith.mulf %166, %170 : vector<1x128xf32>
    %c8_i32 = arith.constant 8 : i32
    %c0_34 = arith.constant 0 : index
    %c0_35 = arith.constant 0 : index
    %172 = vector.load %arg4[%c0_34, %c0_35] : memref<128x1xf32, #tpu.memory_space<vmem>>, vector<128x1xf32>
    %cst_36 = arith.constant dense<0.000000e+00> : vector<1x1xf32>
    %173 = tpu.matmul %171, %172, %cst_36 {dimension_numbers = #tpu.dot_dimension_numbers<[1], [0], [0], [1], [0, 0, 1, 1], [], []>} : vector<1x128xf32>, vector<128x1xf32>, vector<1x1xf32> -> vector<1x1xf32>
    %c0_37 = arith.constant 0 : index
    %c0_38 = arith.constant 0 : index
    %174 = vector.load %arg5[%c0_37, %c0_38] : memref<1x1xf32, #tpu.memory_space<vmem>>, vector<1x1xf32>
    %175 = arith.addf %173, %174 : vector<1x1xf32>
    %c0_39 = arith.constant 0 : index
    %c0_40 = arith.constant 0 : index
    %176 = vector.load %arg6[%c0_39, %c0_40] : memref<1x1xf32, #tpu.memory_space<vmem>>, vector<1x1xf32>
    tpu.vector_store %arg6[%c0_39, %c0_40], %175 {strides = array<i32>} : memref<1x1xf32, #tpu.memory_space<vmem>>, vector<1x1xf32>,
    return
  }
}

</mosaic_0001>

<bundles_post_ra>
// kernel: tpu_custom_call.1
= control target key start
LH: loop header
LB: loop body
LE: loop exit
PB: predicated region body
PF: predicated region fallthrough
CT: control target
= control target key end

     0   :  { %s3056_s0 = inlined_call_operand.vmem [shape: f32[8,1], index: 0, kind: input, shape index: {}]   ;;  %s3057_s1 = inlined_call_operand.vmem [shape: f32[1,512], index: 1, kind: input, shape index: {}]   ;;  %s3058_s2 = inlined_call_operand.hbm [shape: f32[128,512], index: 2, kind: input, shape index: {}]   ;;  %s3059_s3 = inlined_call_operand.vmem [shape: f32[1,512], index: 3, kind: input, shape index: {}]   ;;  %s3060_s4 = inlined_call_operand.vmem [shape: f32[128,1], index: 4, kind: input, shape index: {}]   ;;  %s3061_s5 = inlined_call_operand.<no memory space> [shape: f32[1,1], index: 5, kind: input, shape index: {}]   ;;  %s3062_s6 = inlined_call_operand.hbm [shape: f32[1,1], index: 6, kind: output, shape index: {}]  }
   0x1   :  { %v11_v0 = vstv %s3061_s5 }
   0x2   :  { %12 = vst [vmem:[#allocation3] sm:$0x1] %v11_v0 }
   0x3   :  { %13 = vsyncpa [#allocation5], 0 }
   0x4   :  { %14 = vsyncpa [#allocation6], 0  ;;  %s2539_s23 = smov [#allocation4]   ;;  %s2491_s27 = scalar_lea.hbm %s3058_s2, 8192 }
   0x5   :  { %s24_s24 = sshll.u32 %s2539_s23, 4  ;;  %p2492_p0 = scmp.ne.s32.totalorder %s3058_s2, %s2491_s27  ;;  %s25_s24 = int_to_ptr.vmem [resolvable:$true] %s24_s24 }
   0x6   :  { %p2495_p1 = scmp.lt.u32.totalorder %s2491_s27, %s3058_s2 }
   0x8   :  { %p2497_p2 = pnand %p2495_p1, %p2492_p0 }
   0xa   :  { %2500 = shalt.err (!%p2497_p2)
}
   0xb   :  { %s2501_s5 = scalar_lea.vmem %s25_s24, 8192  ;;  %p2506_p4 = scmp.lt.s32.totalorder %s25_s24, %s25_s24 }
   0xc   :  { %p2502_p3 = scmp.ne.s32.totalorder %s25_s24, %s2501_s5  ;;  %p2507_p5 = scmp.lt.s32.totalorder %s2501_s5, %s2501_s5 }
   0xe   :  { %p2508_p6 = por %p2507_p5, %p2506_p4 }
  0x10   :  { %p2509_p7 = pnand %p2508_p6, %p2502_p3 }
  0x12   :  { %2512 = shalt.err (!%p2509_p7)
}
  0x13   :  { %s2540_s8 = smov 512   ;;  %s2541_s9 = smov 32  }
  0x14   :  { %30 = dma.hbm_to_vmem [thread:$0]  %s3058_s2, 8192, %s25_s24, [#allocation5], %s2540_s8, %s2540_s8, %s2541_s9  }
  0x15   :  { %2535 = dma.done.wait [#allocation5], 8192  }
  0x16   :  { %2536 = vsyncadd [#allocation5], 4294959104  ;;  %v2542_v1 = vmov 0.0   ;;  %v2543_v2 = vmov 0   ;;  %v103_v3 = vld [vmem:[#allocation4 + $0x8] sm:$0xff]  ;;  %v105_v5 = vld [vmem:[#allocation4 + $0x18] sm:$0xff] }
  0x17   :  { %231 = vmatprep.mubr.f32.mxu0 %v2542_v1  ;;  %302 = vmatprep.mubr.f32.mxu1 %v2542_v1  ;;  %v107_v4 = vld [vmem:[#allocation4 + $0x28] sm:$0xff]  ;;  %v109_v7 = vld [vmem:[#allocation4 + $0x38] sm:$0xff]  ;;  %v102_v8 = vld [vmem:[#allocation4] sm:$0xff]  ;;  %vm2546_vm0 = vmmov 0   ;;  %vm1804_vm1 = vcmask 0  }
  0x18   :  { %2426 = vset.pattern.permute.xlu0 %v2543_v2  ;;  %v2600_v6 = vpack.c.bf16 %v107_v4, %v103_v3  ;;  %v106_v9 = vld [vmem:[#allocation4 + $0x20] sm:$0xff]  ;;  %v2602_v10 = vpack.c.bf16 %v109_v7, %v105_v5  ;;  %v104_v12 = vld [vmem:[#allocation4 + $0x10] sm:$0xff]  ;;  %v111_v14 = vld [vmem:[#allocation4 + $0x48] sm:$0xff] }
  0x19   :  { %v2604_v11 = vpack.c.bf16 %v106_v9, %v102_v8  ;;  %v108_v13 = vld [vmem:[#allocation4 + $0x30] sm:$0xff]  ;;  %v115_v16 = vld [vmem:[#allocation4 + $0x68] sm:$0xff]  ;;  %v113_v17 = vld [vmem:[#allocation4 + $0x58] sm:$0xff] }
  0x1a   :  { %1882 = vmatprep.subr.bf16.mxu0 %v2600_v6  ;;  %v2607_v15 = vpack.c.bf16 %v108_v13, %v104_v12  ;;  %v117_v18 = vld [vmem:[#allocation4 + $0x78] sm:$0xff]  ;;  %1914 = vmatprep.subr.bf16.mxu1 %v2602_v10  ;;  %v2611_v19 = vpack.c.bf16 %v115_v16, %v111_v14  ;;  %v110_v21 = vld [vmem:[#allocation4 + $0x40] sm:$0xff]  ;;  %v112_v23 = vld [vmem:[#allocation4 + $0x50] sm:$0xff] }
  0x1b   :  { %1884 = vmatpush1.bf16.msra.mxu0 %v2604_v11  ;;  %v2613_v20 = vpack.c.bf16 %v117_v18, %v113_v17  ;;  %v114_v22 = vld [vmem:[#allocation4 + $0x60] sm:$0xff]  ;;  %v116_v25 = vld [vmem:[#allocation4 + $0x70] sm:$0xff]  ;;  %v119_v26 = vld [vmem:[#allocation4 + $0x88] sm:$0xff] }
  0x1c   :  { %1916 = vmatpush1.bf16.msra.mxu1 %v2607_v15  ;;  %v2616_v24 = vpack.c.bf16 %v114_v22, %v110_v21  ;;  %v123_v27 = vld [vmem:[#allocation4 + $0xa8] sm:$0xff]  ;;  %1886 = vmatprep.subr.bf16.mxu0 %v2611_v19  ;;  %v2620_v28 = vpack.c.bf16 %v116_v25, %v112_v23  ;;  %v121_v30 = vld [vmem:[#allocation4 + $0x98] sm:$0xff]  ;;  %v118_v32 = vld [vmem:[#allocation4 + $0x80] sm:$0xff] }
  0x1d   :  { %1918 = vmatprep.subr.bf16.mxu1 %v2613_v20  ;;  %v2622_v29 = vpack.c.bf16 %v123_v27, %v119_v26  ;;  %v125_v31 = vld [vmem:[#allocation4 + $0xb8] sm:$0xff]  ;;  %v122_v34 = vld [vmem:[#allocation4 + $0xa0] sm:$0xff]  ;;  %v120_v35 = vld [vmem:[#allocation4 + $0x90] sm:$0xff] }
  0x1e   :  { %v2624_v33 = vpack.c.bf16 %v125_v31, %v121_v30  ;;  %v124_v36 = vld [vmem:[#allocation4 + $0xb0] sm:$0xff]  ;;  %v2627_v37 = vpack.c.bf16 %v122_v34, %v118_v32  ;;  %v127_v38 = vld [vmem:[#allocation4 + $0xc8] sm:$0xff]  ;;  %v129_v40 = vld [vmem:[#allocation4 + $0xd8] sm:$0xff] }
  0x1f   :  { %1888 = vmatpush1.bf16.msra.mxu0 %v2616_v24  ;;  %v131_v39 = vld [vmem:[#allocation4 + $0xe8] sm:$0xff]  ;;  %v2631_v41 = vpack.c.bf16 %v124_v36, %v120_v35  ;;  %v133_v43 = vld [vmem:[#allocation4 + $0xf8] sm:$0xff]  ;;  %v126_v44 = vld [vmem:[#allocation4 + $0xc0] sm:$0xff] }
  0x20   :  { %1920 = vmatpush1.bf16.msra.mxu1 %v2620_v28  ;;  %1890 = vmatprep.subr.bf16.mxu0 %v2622_v29  ;;  %v2633_v42 = vpack.c.bf16 %v131_v39, %v127_v38  ;;  %v130_v45 = vld [vmem:[#allocation4 + $0xe0] sm:$0xff]  ;;  %v2636_v46 = vpack.c.bf16 %v133_v43, %v129_v40  ;;  %v128_v47 = vld [vmem:[#allocation4 + $0xd0] sm:$0xff]  ;;  %v135_v49 = vld [vmem:[#allocation4 + $0x108] sm:$0xff] }
  0x21   :  { %1922 = vmatprep.subr.bf16.mxu1 %v2624_v33  ;;  %v132_v48 = vld [vmem:[#allocation4 + $0xf0] sm:$0xff]  ;;  %v139_v50 = vld [vmem:[#allocation4 + $0x128] sm:$0xff]  ;;  %v137_v51 = vld [vmem:[#allocation4 + $0x118] sm:$0xff]  ;;  %v2639_v53 = vpack.c.bf16 %v130_v45, %v126_v44 }
  0x22   :  { %v141_v52 = vld [vmem:[#allocation4 + $0x138] sm:$0xff]  ;;  %v2643_v54 = vpack.c.bf16 %v132_v48, %v128_v47  ;;  %v2645_v55 = vpack.c.bf16 %v139_v50, %v135_v49  ;;  %v134_v56 = vld [vmem:[#allocation4 + $0x100] sm:$0xff]  ;;  %v136_v58 = vld [vmem:[#allocation4 + $0x110] sm:$0xff] }
  0x23   :  { %1892 = vmatpush1.bf16.msra.mxu0 %v2627_v37  ;;  %v138_v57 = vld [vmem:[#allocation4 + $0x120] sm:$0xff]  ;;  %v2648_v59 = vpack.c.bf16 %v141_v52, %v137_v51  ;;  %v140_v60 = vld [vmem:[#allocation4 + $0x130] sm:$0xff]  ;;  %v143_v61 = vld [vmem:[#allocation4 + $0x148] sm:$0xff]  ;;  %v48_v51 = vlaneseq }
  0x24   :  { %1924 = vmatpush1.bf16.msra.mxu1 %v2631_v41  ;;  %1894 = vmatprep.subr.bf16.mxu0 %v2633_v42  ;;  %v147_v62 = vld [vmem:[#allocation4 + $0x168] sm:$0xff]  ;;  %v145_v63 = vld [vmem:[#allocation4 + $0x158] sm:$0xff]  ;;  %v2651_v2 = vpack.c.bf16 %v138_v57, %v134_v56  ;;  %v2655_v3 = vpack.c.bf16 %v140_v60, %v136_v58  ;;  %v142_v5 = vld [vmem:[#allocation4 + $0x140] sm:$0xff] }
  0x25   :  { %1926 = vmatprep.subr.bf16.mxu1 %v2636_v46  ;;  %v149_v0 = vld [vmem:[#allocation4 + $0x178] sm:$0xff]  ;;  %v2657_v4 = vpack.c.bf16 %v147_v62, %v143_v61  ;;  %v146_v7 = vld [vmem:[#allocation4 + $0x160] sm:$0xff]  ;;  %v144_v8 = vld [vmem:[#allocation4 + $0x150] sm:$0xff]  ;;  %v49_v52 = vshrl.u32 %v48_v51, 7 }
  0x26   :  { %v2660_v9 = vpack.c.bf16 %v149_v0, %v145_v63  ;;  %v148_v12 = vld [vmem:[#allocation4 + $0x170] sm:$0xff]  ;;  %v151_v13 = vld [vmem:[#allocation4 + $0x188] sm:$0xff]  ;;  %v153_v16 = vld [vmem:[#allocation4 + $0x198] sm:$0xff]  ;;  %v2663_v18 = vpack.c.bf16 %v146_v7, %v142_v5 }
  0x27   :  { %1896 = vmatpush1.bf16.msra.mxu0 %v2639_v53  ;;  %v155_v14 = vld [vmem:[#allocation4 + $0x1a8] sm:$0xff]  ;;  %v157_v17 = vld [vmem:[#allocation4 + $0x1b8] sm:$0xff]  ;;  %v150_v21 = vld [vmem:[#allocation4 + $0x180] sm:$0xff]  ;;  %v2667_v22 = vpack.c.bf16 %v148_v12, %v144_v8  ;;  %v50_v56 = vsub.s32 0, %v49_v52  ;;  %v54_v57 = vsub.s32 1, %v49_v52  ;;  %v58_v58 = vsub.s32 2, %v49_v52 }
  0x28   :  { %1928 = vmatpush1.bf16.msra.mxu1 %v2643_v54  ;;  %1898 = vmatprep.subr.bf16.mxu0 %v2645_v55  ;;  %v2669_v23 = vpack.c.bf16 %v155_v14, %v151_v13  ;;  %v154_v25 = vld [vmem:[#allocation4 + $0x1a0] sm:$0xff]  ;;  %v152_v26 = vld [vmem:[#allocation4 + $0x190] sm:$0xff]  ;;  %v2675_v30 = vpack.c.bf16 %v157_v17, %v153_v16  ;;  %v159_v32 = vld [vmem:[#allocation4 + $0x1c8] sm:$0xff]  ;;  %v62_v60 = vsub.s32 3, %v49_v52 }
  0x29   :  { %1930 = vmatprep.subr.bf16.mxu1 %v2648_v59  ;;  %v40_v27 = vld [vmem:[%s3056_s0] sm:$0xff]  ;;  %v156_v31 = vld [vmem:[#allocation4 + $0x1b0] sm:$0xff]  ;;  %v163_v34 = vld [vmem:[#allocation4 + $0x1e8] sm:$0xff]  ;;  %v2678_v38 = vpack.c.bf16 %v154_v25, %v150_v21 }
  0x2a   :  { %44 = vperm.xlu0 %2426, %v40_v27   ;;  %v161_v35 = vld [vmem:[#allocation4 + $0x1d8] sm:$0xff]  ;;  %v2682_v39 = vpack.c.bf16 %v156_v31, %v152_v26  ;;  %v2684_v40 = vpack.c.bf16 %v163_v34, %v159_v32  ;;  %v158_v43 = vld [vmem:[#allocation4 + $0x1c0] sm:$0xff]  ;;  %v160_v47 = vld [vmem:[#allocation4 + $0x1d0] sm:$0xff] }
  0x2b   :  { %1900 = vmatpush1.bf16.msra.mxu0 %v2651_v2  ;;  %v165_v36 = vld [vmem:[#allocation4 + $0x1f8] sm:$0xff]  ;;  %v162_v44 = vld [vmem:[#allocation4 + $0x1e0] sm:$0xff]  ;;  %v164_v48 = vld [vmem:[#allocation4 + $0x1f0] sm:$0xff] }
  0x2c   :  { %1932 = vmatpush1.bf16.msra.mxu1 %v2655_v3  ;;  %1902 = vmatprep.subr.bf16.mxu0 %v2657_v4  ;;  %v2687_v45 = vpack.c.bf16 %v165_v36, %v161_v35  ;;  %v2690_v49 = vpack.c.bf16 %v162_v44, %v158_v43  ;;  %v2694_v50 = vpack.c.bf16 %v164_v48, %v160_v47  ;;  %v41_v61 = vld [vmem:[%s3057_s1] sm:$0xf]  ;;  %v2544_v35 = vmov 1966171168  }
  0x2d   :  { %1934 = vmatprep.subr.bf16.mxu1 %v2660_v9  ;;  %v72_v62 = vld [vmem:[%s3059_s3] sm:$0xf]  ;;  %v51_v63 = vrot.slane %v41_v61, %v50_v56  ;;  %v55_v0 = vrot.slane %v41_v61, %v54_v57  ;;  %v59_v5 = vrot.slane %v41_v61, %v58_v58  ;;  %v63_v7 = vrot.slane %v41_v61, %v62_v60 }
  0x2e   :  { %v77_v8 = vrot.slane %v72_v62, %v50_v56  ;;  %v81_v12 = vrot.slane %v72_v62, %v54_v57  ;;  %v85_v13 = vrot.slane %v72_v62, %v58_v58  ;;  %v89_v14 = vrot.slane %v72_v62, %v62_v60 }
  0x2f   :  { %1904 = vmatpush1.bf16.msra.mxu0 %v2663_v18  ;;  %v316_v36 = vunpack.c.l.s4 %v2544_v35 }
  0x30   :  { %1936 = vmatpush1.bf16.msra.mxu1 %v2667_v22  ;;  %1906 = vmatprep.subr.bf16.mxu0 %v2669_v23 }
  0x31   :  { %1938 = vmatprep.subr.bf16.mxu1 %v2675_v30  ;;  %v317_v43 = vunpack.c.0.s8 %v316_v36 }
  0x33   :  { %1908 = vmatpush1.bf16.msra.mxu0 %v2678_v38  ;;  %v2743_v44 = vsub.s32 %v317_v43, %v49_v52 }
  0x34   :  { %1940 = vmatpush1.bf16.msra.mxu1 %v2682_v39  ;;  %1910 = vmatprep.subr.bf16.mxu0 %v2684_v40 }
  0x35   :  { %1942 = vmatprep.subr.bf16.mxu1 %v2687_v45 }
  0x37   :  { %1912 = vmatpush1.bf16.msra.mxu0 %v2690_v49 }
  0x38   :  { %1944 = vmatpush1.bf16.msra.mxu1 %v2694_v50  ;;  %1946 = vmatprep.subr.bf16.mxu0 %v2600_v6 }
  0x39   :  { %1978 = vmatprep.subr.bf16.mxu1 %v2602_v10 }
  0x3a   :  { %232 = vmatmul.mubr.f32.vlgmr.msra.gmra.mrb[0].mxu0 %v2542_v1 }
  0x3b   :  { %303 = vmatmul.mubr.f32.vlgmr.msra.gmra.mrb[0].mxu1 %v2542_v1  ;;  %1948 = vmatpush1.bf16.msra.mxu0 %v2604_v11 }
  0x3c   :  { %1980 = vmatpush1.bf16.msra.mxu1 %v2607_v15  ;;  %1950 = vmatprep.subr.bf16.mxu0 %v2611_v19 }
  0x3d   :  { %1982 = vmatprep.subr.bf16.mxu1 %v2613_v20  ;;  %425 = vmatprep.mubr.f32.mxu0 %v2542_v1 }
  0x3e   :  { %496 = vmatprep.mubr.f32.mxu1 %v2542_v1 }
  0x3f   :  { %1952 = vmatpush1.bf16.msra.mxu0 %v2616_v24 }
  0x40   :  { %1984 = vmatpush1.bf16.msra.mxu1 %v2620_v28  ;;  %1954 = vmatprep.subr.bf16.mxu0 %v2622_v29 }
  0x41   :  { %1986 = vmatprep.subr.bf16.mxu1 %v2624_v33 }
  0x43   :  { %1956 = vmatpush1.bf16.msra.mxu0 %v2627_v37 }
  0x44   :  { %1988 = vmatpush1.bf16.msra.mxu1 %v2631_v41  ;;  %1958 = vmatprep.subr.bf16.mxu0 %v2633_v42 }
  0x45   :  { %1990 = vmatprep.subr.bf16.mxu1 %v2636_v46 }
  0x47   :  { %1960 = vmatpush1.bf16.msra.mxu0 %v2639_v53 }
  0x48   :  { %1992 = vmatpush1.bf16.msra.mxu1 %v2643_v54  ;;  %1962 = vmatprep.subr.bf16.mxu0 %v2645_v55 }
  0x49   :  { %1994 = vmatprep.subr.bf16.mxu1 %v2648_v59 }
  0x4b   :  { %1964 = vmatpush1.bf16.msra.mxu0 %v2651_v2 }
  0x4c   :  { %1996 = vmatpush1.bf16.msra.mxu1 %v2655_v3  ;;  %1966 = vmatprep.subr.bf16.mxu0 %v2657_v4 }
  0x4d   :  { %1998 = vmatprep.subr.bf16.mxu1 %v2660_v9 }
  0x4f   :  { %1968 = vmatpush1.bf16.msra.mxu0 %v2663_v18 }
  0x50   :  { %2000 = vmatpush1.bf16.msra.mxu1 %v2667_v22  ;;  %1970 = vmatprep.subr.bf16.mxu0 %v2669_v23 }
  0x51   :  { %2002 = vmatprep.subr.bf16.mxu1 %v2675_v30 }
  0x53   :  { %1972 = vmatpush1.bf16.msra.mxu0 %v2678_v38 }
  0x54   :  { %2004 = vmatpush1.bf16.msra.mxu1 %v2682_v39  ;;  %1974 = vmatprep.subr.bf16.mxu0 %v2684_v40 }
  0x55   :  { %2006 = vmatprep.subr.bf16.mxu1 %v2687_v45 }
  0x57   :  { %1976 = vmatpush1.bf16.msra.mxu0 %v2690_v49 }
  0x58   :  { %2008 = vmatpush1.bf16.msra.mxu1 %v2694_v50  ;;  %2010 = vmatprep.subr.bf16.mxu0 %v2600_v6 }
  0x59   :  { %2042 = vmatprep.subr.bf16.mxu1 %v2602_v10 }
  0xa9   :  { %v45_v16 = vpop.permute.xlu0 %44 }
  0xaa   :  { %v68_v17 = vmul.f32 %v51_v63, %v45_v16  ;;  %v69_v21 = vmul.f32 %v55_v0, %v45_v16  ;;  %v70_v25 = vmul.f32 %v59_v5, %v45_v16  ;;  %v71_v26 = vmul.f32 %v63_v7, %v45_v16 }
  0xac   :  { %v94_v27 = vadd.f32 %v77_v8, %v68_v17  ;;  %v95_v31 = vadd.f32 %v81_v12, %v69_v21  ;;  %v96_v32 = vadd.f32 %v85_v13, %v70_v25  ;;  %v97_v34 = vadd.f32 %v89_v14, %v71_v26 }
  0xae   :  { %98 = vst [vmem:[#allocation2] sm:$0xff] %v94_v27  ;;  %99 = vst [vmem:[#allocation2 + $0x8] sm:$0xff] %v95_v31 }
  0xaf   :  { %100 = vst [vmem:[#allocation2 + $0x10] sm:$0xff] %v96_v32  ;;  %101 = vst [vmem:[#allocation2 + $0x18] sm:$0xff] %v97_v34 }
  0xb6   :  { %v166_v63 = vld [vmem:[#allocation2] ss:$8 sm:$0xf] }
 0x10d   :  { %v233_v47 = vpop.f32.mrb[0].mxu0 }
 0x10e   :  { %v304_v48 = vpop.f32.mrb[0].mxu1  ;;  %v235_v51 = vpop.f32.mrb[1].mxu0 }
 0x10f   :  { %v313_v56 = vcombine.low %v233_v47, %v235_v51  ;;  %v306_v57 = vpop.f32.mrb[1].mxu1 }
 0x110   :  { %v314_v58 = vcombine.low %v304_v48, %v306_v57 }
 0x111   :  { %v321_v60 = vrot.slane %v313_v56, %v2743_v44 }
 0x112   :  { %v328_v61 = vrot.slane %v314_v58, %v2743_v44  ;;  %v360_v58 = vld [vmem:[#allocation2 + $0x1] ss:$8 sm:$0xf] }
 0x114   :  { %v329_v62 = vcombine.low %v321_v60, %v328_v61 }
 0x116   :  { %v336_v0 = vrot.slane %v329_v62, %v2743_v44 }
 0x118   :  { %v338_v5 = vadd.f32 %v336_v0, %v166_v63 }
 0x11a   :  { %v1821_v7 = vmul.f32 -1.442695, %v338_v5  ;;  %v346_v12 = vrot.slane %v338_v5, 3 }
 0x11c   :  { %2427 = vpow2.f32 %v1821_v7 }
 0x126   :  { %v2428_v8 = vpop.eup %2427 }
 0x127   :  { %v342_v52 = vadd.f32 1.0, %v2428_v8 }
 0x129   :  { %2429 = vrcp.f32 %v342_v52 }
 0x12a   :  { %2431 = vtanh.f32 %v346_v12 }
 0x133   :  { %v2430_v13 = vpop.eup %2429 }
 0x134   :  { %v350_v14 = vrot.slane %v2430_v13, 1  ;;  %v2432_v16 = vpop.eup %2431  ;;  %v356_v26 = vrot.slane %v2430_v13, 2 }
 0x135   :  { %v353_v17 = vmul.f32 %v2432_v16, %v2430_v13 }
 0x136   :  { %v352_v21 = vmul.f32 0.0, %v350_v14 }
 0x138   :  { %v2748_v25 = vadd.f32 %v353_v17, %v352_v21 }
 0x13a   :  { %2433 = vtanh.f32 %v2748_v25 }
 0x144   :  { %v2434_v27 = vpop.eup %2433 }
 0x145   :  { %v358_v31 = vmul.f32 %v2434_v27, %v356_v26 }
 0x147   :  { %426 = vmatmul.mubr.f32.vlgmr.msra.gmra.mrb[2].mxu0 %v358_v31  ;;  %497 = vmatmul.mubr.f32.vlgmr.msra.gmra.mrb[2].mxu1 %v358_v31 }
 0x148   :  { %2012 = vmatpush1.bf16.msra.mxu0 %v2604_v11  ;;  %2044 = vmatpush1.bf16.msra.mxu1 %v2607_v15 }
 0x149   :  { %2014 = vmatprep.subr.bf16.mxu0 %v2611_v19  ;;  %2046 = vmatprep.subr.bf16.mxu1 %v2613_v20 }
 0x14a   :  { %619 = vmatprep.mubr.f32.mxu0 %v2542_v1  ;;  %690 = vmatprep.mubr.f32.mxu1 %v2542_v1 }
 0x14c   :  { %2016 = vmatpush1.bf16.msra.mxu0 %v2616_v24  ;;  %2048 = vmatpush1.bf16.msra.mxu1 %v2620_v28 }
 0x14d   :  { %2018 = vmatprep.subr.bf16.mxu0 %v2622_v29  ;;  %2050 = vmatprep.subr.bf16.mxu1 %v2624_v33 }
 0x150   :  { %2020 = vmatpush1.bf16.msra.mxu0 %v2627_v37  ;;  %2052 = vmatpush1.bf16.msra.mxu1 %v2631_v41 }
 0x151   :  { %2022 = vmatprep.subr.bf16.mxu0 %v2633_v42  ;;  %2054 = vmatprep.subr.bf16.mxu1 %v2636_v46 }
 0x154   :  { %2024 = vmatpush1.bf16.msra.mxu0 %v2639_v53  ;;  %2056 = vmatpush1.bf16.msra.mxu1 %v2643_v54 }
 0x155   :  { %2026 = vmatprep.subr.bf16.mxu0 %v2645_v55  ;;  %2058 = vmatprep.subr.bf16.mxu1 %v2648_v59 }
 0x158   :  { %2028 = vmatpush1.bf16.msra.mxu0 %v2651_v2  ;;  %2060 = vmatpush1.bf16.msra.mxu1 %v2655_v3 }
 0x159   :  { %2030 = vmatprep.subr.bf16.mxu0 %v2657_v4  ;;  %2062 = vmatprep.subr.bf16.mxu1 %v2660_v9 }
 0x15c   :  { %2032 = vmatpush1.bf16.msra.mxu0 %v2663_v18  ;;  %2064 = vmatpush1.bf16.msra.mxu1 %v2667_v22 }
 0x15d   :  { %2034 = vmatprep.subr.bf16.mxu0 %v2669_v23  ;;  %2066 = vmatprep.subr.bf16.mxu1 %v2675_v30 }
 0x160   :  { %2036 = vmatpush1.bf16.msra.mxu0 %v2678_v38  ;;  %2068 = vmatpush1.bf16.msra.mxu1 %v2682_v39 }
 0x161   :  { %2038 = vmatprep.subr.bf16.mxu0 %v2684_v40  ;;  %2070 = vmatprep.subr.bf16.mxu1 %v2687_v45 }
 0x164   :  { %2040 = vmatpush1.bf16.msra.mxu0 %v2690_v49  ;;  %2072 = vmatpush1.bf16.msra.mxu1 %v2694_v50 }
 0x165   :  { %2074 = vmatprep.subr.bf16.mxu0 %v2600_v6  ;;  %2106 = vmatprep.subr.bf16.mxu1 %v2602_v10 }
 0x21a   :  { %v427_v32 = vpop.f32.mrb[2].mxu0  ;;  %v498_v34 = vpop.f32.mrb[2].mxu1 }
 0x21b   :  { %v429_v35 = vpop.f32.mrb[3].mxu0  ;;  %v500_v36 = vpop.f32.mrb[3].mxu1 }
 0x21c   :  { %v507_v43 = vcombine.low %v427_v32, %v429_v35  ;;  %v508_v47 = vcombine.low %v498_v34, %v500_v36 }
 0x21e   :  { %v515_v48 = vrot.slane %v507_v43, %v2743_v44  ;;  %v522_v51 = vrot.slane %v508_v47, %v2743_v44  ;;  %v554_v47 = vld [vmem:[#allocation2 + $0x2] ss:$8 sm:$0xf] }
 0x220   :  { %v523_v56 = vcombine.low %v515_v48, %v522_v51 }
 0x222   :  { %v530_v57 = vrot.slane %v523_v56, %v2743_v44 }
 0x224   :  { %v532_v60 = vadd.f32 %v530_v57, %v360_v58 }
 0x226   :  { %v1822_v61 = vmul.f32 -1.442695, %v532_v60  ;;  %v540_v0 = vrot.slane %v532_v60, 3 }
 0x228   :  { %2435 = vpow2.f32 %v1822_v61 }
 0x232   :  { %v2436_v62 = vpop.eup %2435 }
 0x233   :  { %v536_v63 = vadd.f32 1.0, %v2436_v62 }
 0x235   :  { %2437 = vrcp.f32 %v536_v63 }
 0x236   :  { %2439 = vtanh.f32 %v540_v0 }
 0x23f   :  { %v2438_v5 = vpop.eup %2437 }
 0x240   :  { %v544_v7 = vrot.slane %v2438_v5, 1  ;;  %v2440_v8 = vpop.eup %2439  ;;  %v550_v14 = vrot.slane %v2438_v5, 2 }
 0x241   :  { %v547_v52 = vmul.f32 %v2440_v8, %v2438_v5 }
 0x242   :  { %v546_v12 = vmul.f32 %v544_v7, %v2748_v25 }
 0x244   :  { %v2789_v13 = vadd.f32 %v547_v52, %v546_v12 }
 0x246   :  { %2441 = vtanh.f32 %v2789_v13 }
 0x250   :  { %v2442_v16 = vpop.eup %2441 }
 0x251   :  { %v552_v17 = vmul.f32 %v2442_v16, %v550_v14 }
 0x253   :  { %620 = vmatmul.mubr.f32.vlgmr.msra.gmra.mrb[4].mxu0 %v552_v17  ;;  %691 = vmatmul.mubr.f32.vlgmr.msra.gmra.mrb[4].mxu1 %v552_v17 }
 0x254   :  { %2076 = vmatpush1.bf16.msra.mxu0 %v2604_v11  ;;  %2108 = vmatpush1.bf16.msra.mxu1 %v2607_v15 }
 0x255   :  { %2078 = vmatprep.subr.bf16.mxu0 %v2611_v19  ;;  %2110 = vmatprep.subr.bf16.mxu1 %v2613_v20 }
 0x256   :  { %813 = vmatprep.mubr.f32.mxu0 %v2542_v1  ;;  %884 = vmatprep.mubr.f32.mxu1 %v2542_v1 }
 0x258   :  { %2080 = vmatpush1.bf16.msra.mxu0 %v2616_v24  ;;  %2112 = vmatpush1.bf16.msra.mxu1 %v2620_v28 }
 0x259   :  { %2082 = vmatprep.subr.bf16.mxu0 %v2622_v29  ;;  %2114 = vmatprep.subr.bf16.mxu1 %v2624_v33 }
 0x25c   :  { %2084 = vmatpush1.bf16.msra.mxu0 %v2627_v37  ;;  %2116 = vmatpush1.bf16.msra.mxu1 %v2631_v41 }
 0x25d   :  { %2086 = vmatprep.subr.bf16.mxu0 %v2633_v42  ;;  %2118 = vmatprep.subr.bf16.mxu1 %v2636_v46 }
 0x260   :  { %2088 = vmatpush1.bf16.msra.mxu0 %v2639_v53  ;;  %2120 = vmatpush1.bf16.msra.mxu1 %v2643_v54 }
 0x261   :  { %2090 = vmatprep.subr.bf16.mxu0 %v2645_v55  ;;  %2122 = vmatprep.subr.bf16.mxu1 %v2648_v59 }
 0x264   :  { %2092 = vmatpush1.bf16.msra.mxu0 %v2651_v2  ;;  %2124 = vmatpush1.bf16.msra.mxu1 %v2655_v3 }
 0x265   :  { %2094 = vmatprep.subr.bf16.mxu0 %v2657_v4  ;;  %2126 = vmatprep.subr.bf16.mxu1 %v2660_v9 }
 0x268   :  { %2096 = vmatpush1.bf16.msra.mxu0 %v2663_v18  ;;  %2128 = vmatpush1.bf16.msra.mxu1 %v2667_v22 }
 0x269   :  { %2098 = vmatprep.subr.bf16.mxu0 %v2669_v23  ;;  %2130 = vmatprep.subr.bf16.mxu1 %v2675_v30 }
 0x26c   :  { %2100 = vmatpush1.bf16.msra.mxu0 %v2678_v38  ;;  %2132 = vmatpush1.bf16.msra.mxu1 %v2682_v39 }
 0x26d   :  { %2102 = vmatprep.subr.bf16.mxu0 %v2684_v40  ;;  %2134 = vmatprep.subr.bf16.mxu1 %v2687_v45 }
 0x270   :  { %2104 = vmatpush1.bf16.msra.mxu0 %v2690_v49  ;;  %2136 = vmatpush1.bf16.msra.mxu1 %v2694_v50 }
 0x271   :  { %2138 = vmatprep.subr.bf16.mxu0 %v2600_v6  ;;  %2170 = vmatprep.subr.bf16.mxu1 %v2602_v10 }
 0x326   :  { %v621_v21 = vpop.f32.mrb[4].mxu0  ;;  %v692_v25 = vpop.f32.mrb[4].mxu1 }
 0x327   :  { %v623_v26 = vpop.f32.mrb[5].mxu0  ;;  %v694_v27 = vpop.f32.mrb[5].mxu1 }
 0x328   :  { %v701_v31 = vcombine.low %v621_v21, %v623_v26  ;;  %v702_v32 = vcombine.low %v692_v25, %v694_v27 }
 0x32a   :  { %v709_v34 = vrot.slane %v701_v31, %v2743_v44  ;;  %v716_v35 = vrot.slane %v702_v32, %v2743_v44  ;;  %v748_v32 = vld [vmem:[#allocation2 + $0x3] ss:$8 sm:$0xf] }
 0x32c   :  { %v717_v36 = vcombine.low %v709_v34, %v716_v35 }
 0x32e   :  { %v724_v43 = vrot.slane %v717_v36, %v2743_v44 }
 0x330   :  { %v726_v48 = vadd.f32 %v724_v43, %v554_v47 }
 0x332   :  { %v1823_v51 = vmul.f32 -1.442695, %v726_v48  ;;  %v734_v58 = vrot.slane %v726_v48, 3 }
 0x334   :  { %2443 = vpow2.f32 %v1823_v51 }
 0x33e   :  { %v2444_v56 = vpop.eup %2443 }
 0x33f   :  { %v730_v57 = vadd.f32 1.0, %v2444_v56 }
 0x341   :  { %2445 = vrcp.f32 %v730_v57 }
 0x342   :  { %2447 = vtanh.f32 %v734_v58 }
 0x34b   :  { %v2446_v60 = vpop.eup %2445 }
 0x34c   :  { %v738_v61 = vrot.slane %v2446_v60, 1  ;;  %v2448_v62 = vpop.eup %2447  ;;  %v744_v7 = vrot.slane %v2446_v60, 2 }
 0x34d   :  { %v741_v63 = vmul.f32 %v2448_v62, %v2446_v60 }
 0x34e   :  { %v740_v0 = vmul.f32 %v738_v61, %v2789_v13 }
 0x350   :  { %v2830_v5 = vadd.f32 %v741_v63, %v740_v0 }
 0x352   :  { %2449 = vtanh.f32 %v2830_v5 }
 0x35c   :  { %v2450_v8 = vpop.eup %2449 }
 0x35d   :  { %v746_v52 = vmul.f32 %v2450_v8, %v744_v7 }
 0x35f   :  { %814 = vmatmul.mubr.f32.vlgmr.msra.gmra.mrb[6].mxu0 %v746_v52  ;;  %885 = vmatmul.mubr.f32.vlgmr.msra.gmra.mrb[6].mxu1 %v746_v52 }
 0x360   :  { %2140 = vmatpush1.bf16.msra.mxu0 %v2604_v11  ;;  %2172 = vmatpush1.bf16.msra.mxu1 %v2607_v15 }
 0x361   :  { %2142 = vmatprep.subr.bf16.mxu0 %v2611_v19  ;;  %2174 = vmatprep.subr.bf16.mxu1 %v2613_v20 }
 0x362   :  { %1007 = vmatprep.mubr.f32.mxu0 %v2542_v1  ;;  %1078 = vmatprep.mubr.f32.mxu1 %v2542_v1 }
 0x364   :  { %2144 = vmatpush1.bf16.msra.mxu0 %v2616_v24  ;;  %2176 = vmatpush1.bf16.msra.mxu1 %v2620_v28 }
 0x365   :  { %2146 = vmatprep.subr.bf16.mxu0 %v2622_v29  ;;  %2178 = vmatprep.subr.bf16.mxu1 %v2624_v33 }
 0x368   :  { %2148 = vmatpush1.bf16.msra.mxu0 %v2627_v37  ;;  %2180 = vmatpush1.bf16.msra.mxu1 %v2631_v41 }
 0x369   :  { %2150 = vmatprep.subr.bf16.mxu0 %v2633_v42  ;;  %2182 = vmatprep.subr.bf16.mxu1 %v2636_v46 }
 0x36c   :  { %2152 = vmatpush1.bf16.msra.mxu0 %v2639_v53  ;;  %2184 = vmatpush1.bf16.msra.mxu1 %v2643_v54 }
 0x36d   :  { %2154 = vmatprep.subr.bf16.mxu0 %v2645_v55  ;;  %2186 = vmatprep.subr.bf16.mxu1 %v2648_v59 }
 0x370   :  { %2156 = vmatpush1.bf16.msra.mxu0 %v2651_v2  ;;  %2188 = vmatpush1.bf16.msra.mxu1 %v2655_v3 }
 0x371   :  { %2158 = vmatprep.subr.bf16.mxu0 %v2657_v4  ;;  %2190 = vmatprep.subr.bf16.mxu1 %v2660_v9 }
 0x374   :  { %2160 = vmatpush1.bf16.msra.mxu0 %v2663_v18  ;;  %2192 = vmatpush1.bf16.msra.mxu1 %v2667_v22 }
 0x375   :  { %2162 = vmatprep.subr.bf16.mxu0 %v2669_v23  ;;  %2194 = vmatprep.subr.bf16.mxu1 %v2675_v30 }
 0x378   :  { %2164 = vmatpush1.bf16.msra.mxu0 %v2678_v38  ;;  %2196 = vmatpush1.bf16.msra.mxu1 %v2682_v39 }
 0x379   :  { %2166 = vmatprep.subr.bf16.mxu0 %v2684_v40  ;;  %2198 = vmatprep.subr.bf16.mxu1 %v2687_v45 }
 0x37c   :  { %2168 = vmatpush1.bf16.msra.mxu0 %v2690_v49  ;;  %2200 = vmatpush1.bf16.msra.mxu1 %v2694_v50 }
 0x37d   :  { %2202 = vmatprep.subr.bf16.mxu0 %v2600_v6  ;;  %2234 = vmatprep.subr.bf16.mxu1 %v2602_v10 }
 0x432   :  { %v815_v12 = vpop.f32.mrb[6].mxu0  ;;  %v886_v13 = vpop.f32.mrb[6].mxu1 }
 0x433   :  { %v817_v14 = vpop.f32.mrb[7].mxu0  ;;  %v888_v16 = vpop.f32.mrb[7].mxu1 }
 0x434   :  { %v895_v17 = vcombine.low %v815_v12, %v817_v14  ;;  %v896_v21 = vcombine.low %v886_v13, %v888_v16 }
 0x436   :  { %v903_v25 = vrot.slane %v895_v17, %v2743_v44  ;;  %v910_v26 = vrot.slane %v896_v21, %v2743_v44  ;;  %v942_v21 = vld [vmem:[#allocation2 + $0x4] ss:$8 sm:$0xf] }
 0x438   :  { %v911_v27 = vcombine.low %v903_v25, %v910_v26 }
 0x43a   :  { %v918_v31 = vrot.slane %v911_v27, %v2743_v44 }
 0x43c   :  { %v920_v34 = vadd.f32 %v918_v31, %v748_v32 }
 0x43e   :  { %v1824_v35 = vmul.f32 -1.442695, %v920_v34  ;;  %v928_v47 = vrot.slane %v920_v34, 3 }
 0x440   :  { %2451 = vpow2.f32 %v1824_v35 }
 0x44a   :  { %v2452_v36 = vpop.eup %2451 }
 0x44b   :  { %v924_v43 = vadd.f32 1.0, %v2452_v36 }
 0x44d   :  { %2453 = vrcp.f32 %v924_v43 }
 0x44e   :  { %2455 = vtanh.f32 %v928_v47 }
 0x457   :  { %v2454_v48 = vpop.eup %2453 }
 0x458   :  { %v932_v51 = vrot.slane %v2454_v48, 1  ;;  %v2456_v56 = vpop.eup %2455  ;;  %v938_v61 = vrot.slane %v2454_v48, 2 }
 0x459   :  { %v935_v57 = vmul.f32 %v2456_v56, %v2454_v48 }
 0x45a   :  { %v934_v58 = vmul.f32 %v932_v51, %v2830_v5 }
 0x45c   :  { %v2871_v60 = vadd.f32 %v935_v57, %v934_v58 }
 0x45e   :  { %2457 = vtanh.f32 %v2871_v60 }
 0x468   :  { %v2458_v62 = vpop.eup %2457 }
 0x469   :  { %v940_v63 = vmul.f32 %v2458_v62, %v938_v61 }
 0x46b   :  { %1008 = vmatmul.mubr.f32.vlgmr.msra.gmra.mrb[8].mxu0 %v940_v63  ;;  %1079 = vmatmul.mubr.f32.vlgmr.msra.gmra.mrb[8].mxu1 %v940_v63 }
 0x46c   :  { %2204 = vmatpush1.bf16.msra.mxu0 %v2604_v11  ;;  %2236 = vmatpush1.bf16.msra.mxu1 %v2607_v15 }
 0x46d   :  { %2206 = vmatprep.subr.bf16.mxu0 %v2611_v19  ;;  %2238 = vmatprep.subr.bf16.mxu1 %v2613_v20 }
 0x46e   :  { %1201 = vmatprep.mubr.f32.mxu0 %v2542_v1  ;;  %1272 = vmatprep.mubr.f32.mxu1 %v2542_v1 }
 0x470   :  { %2208 = vmatpush1.bf16.msra.mxu0 %v2616_v24  ;;  %2240 = vmatpush1.bf16.msra.mxu1 %v2620_v28 }
 0x471   :  { %2210 = vmatprep.subr.bf16.mxu0 %v2622_v29  ;;  %2242 = vmatprep.subr.bf16.mxu1 %v2624_v33 }
 0x474   :  { %2212 = vmatpush1.bf16.msra.mxu0 %v2627_v37  ;;  %2244 = vmatpush1.bf16.msra.mxu1 %v2631_v41 }
 0x475   :  { %2214 = vmatprep.subr.bf16.mxu0 %v2633_v42  ;;  %2246 = vmatprep.subr.bf16.mxu1 %v2636_v46 }
 0x478   :  { %2216 = vmatpush1.bf16.msra.mxu0 %v2639_v53  ;;  %2248 = vmatpush1.bf16.msra.mxu1 %v2643_v54 }
 0x479   :  { %2218 = vmatprep.subr.bf16.mxu0 %v2645_v55  ;;  %2250 = vmatprep.subr.bf16.mxu1 %v2648_v59 }
 0x47c   :  { %2220 = vmatpush1.bf16.msra.mxu0 %v2651_v2  ;;  %2252 = vmatpush1.bf16.msra.mxu1 %v2655_v3 }
 0x47d   :  { %2222 = vmatprep.subr.bf16.mxu0 %v2657_v4  ;;  %2254 = vmatprep.subr.bf16.mxu1 %v2660_v9 }
 0x480   :  { %2224 = vmatpush1.bf16.msra.mxu0 %v2663_v18  ;;  %2256 = vmatpush1.bf16.msra.mxu1 %v2667_v22 }
 0x481   :  { %2226 = vmatprep.subr.bf16.mxu0 %v2669_v23  ;;  %2258 = vmatprep.subr.bf16.mxu1 %v2675_v30 }
 0x484   :  { %2228 = vmatpush1.bf16.msra.mxu0 %v2678_v38  ;;  %2260 = vmatpush1.bf16.msra.mxu1 %v2682_v39 }
 0x485   :  { %2230 = vmatprep.subr.bf16.mxu0 %v2684_v40  ;;  %2262 = vmatprep.subr.bf16.mxu1 %v2687_v45 }
 0x488   :  { %2232 = vmatpush1.bf16.msra.mxu0 %v2690_v49  ;;  %2264 = vmatpush1.bf16.msra.mxu1 %v2694_v50 }
 0x489   :  { %2266 = vmatprep.subr.bf16.mxu0 %v2600_v6  ;;  %2298 = vmatprep.subr.bf16.mxu1 %v2602_v10 }
 0x53e   :  { %v1009_v0 = vpop.f32.mrb[8].mxu0  ;;  %v1080_v5 = vpop.f32.mrb[8].mxu1 }
 0x53f   :  { %v1011_v7 = vpop.f32.mrb[9].mxu0  ;;  %v1082_v8 = vpop.f32.mrb[9].mxu1 }
 0x540   :  { %v1089_v52 = vcombine.low %v1009_v0, %v1011_v7  ;;  %v1090_v12 = vcombine.low %v1080_v5, %v1082_v8 }
 0x542   :  { %v1097_v13 = vrot.slane %v1089_v52, %v2743_v44  ;;  %v1104_v14 = vrot.slane %v1090_v12, %v2743_v44  ;;  %v1136_v12 = vld [vmem:[#allocation2 + $0x5] ss:$8 sm:$0xf] }
 0x544   :  { %v1105_v16 = vcombine.low %v1097_v13, %v1104_v14 }
 0x546   :  { %v1112_v17 = vrot.slane %v1105_v16, %v2743_v44 }
 0x548   :  { %v1114_v25 = vadd.f32 %v1112_v17, %v942_v21 }
 0x54a   :  { %v1825_v26 = vmul.f32 -1.442695, %v1114_v25  ;;  %v1122_v32 = vrot.slane %v1114_v25, 3 }
 0x54c   :  { %2459 = vpow2.f32 %v1825_v26 }
 0x556   :  { %v2460_v27 = vpop.eup %2459 }
 0x557   :  { %v1118_v31 = vadd.f32 1.0, %v2460_v27 }
 0x559   :  { %2461 = vrcp.f32 %v1118_v31 }
 0x55a   :  { %2463 = vtanh.f32 %v1122_v32 }
 0x563   :  { %v2462_v34 = vpop.eup %2461 }
 0x564   :  { %v1126_v35 = vrot.slane %v2462_v34, 1  ;;  %v2464_v36 = vpop.eup %2463  ;;  %v1132_v51 = vrot.slane %v2462_v34, 2 }
 0x565   :  { %v1129_v43 = vmul.f32 %v2464_v36, %v2462_v34  ;;  %v1720_v36 = vld [vmem:[%s3060_s4 + $0x18] sm:$0xff] }
 0x566   :  { %v1128_v47 = vmul.f32 %v1126_v35, %v2871_v60 }
 0x568   :  { %v2912_v48 = vadd.f32 %v1129_v43, %v1128_v47  ;;  %v1721_v47 = vld [vmem:[%s3060_s4 + $0x20] sm:$0xff] }
 0x56a   :  { %2465 = vtanh.f32 %v2912_v48 }
 0x574   :  { %v2466_v56 = vpop.eup %2465 }
 0x575   :  { %v1134_v57 = vmul.f32 %v2466_v56, %v1132_v51  ;;  %v1723_v56 = vld [vmem:[%s3060_s4 + $0x30] sm:$0xff] }
 0x577   :  { %1202 = vmatmul.mubr.f32.vlgmr.msra.gmra.mrb[10].mxu0 %v1134_v57  ;;  %1273 = vmatmul.mubr.f32.vlgmr.msra.gmra.mrb[10].mxu1 %v1134_v57  ;;  %v1724_v57 = vld [vmem:[%s3060_s4 + $0x38] sm:$0xff] }
 0x578   :  { %2268 = vmatpush1.bf16.msra.mxu0 %v2604_v11  ;;  %2300 = vmatpush1.bf16.msra.mxu1 %v2607_v15 }
 0x579   :  { %2270 = vmatprep.subr.bf16.mxu0 %v2611_v19  ;;  %2302 = vmatprep.subr.bf16.mxu1 %v2613_v20 }
 0x57a   :  { %1395 = vmatprep.mubr.f32.mxu0 %v2542_v1  ;;  %1466 = vmatprep.mubr.f32.mxu1 %v2542_v1 }
 0x57c   :  { %2272 = vmatpush1.bf16.msra.mxu0 %v2616_v24  ;;  %2304 = vmatpush1.bf16.msra.mxu1 %v2620_v28 }
 0x57d   :  { %2274 = vmatprep.subr.bf16.mxu0 %v2622_v29  ;;  %2306 = vmatprep.subr.bf16.mxu1 %v2624_v33 }
 0x580   :  { %2276 = vmatpush1.bf16.msra.mxu0 %v2627_v37  ;;  %2308 = vmatpush1.bf16.msra.mxu1 %v2631_v41 }
 0x581   :  { %2278 = vmatprep.subr.bf16.mxu0 %v2633_v42  ;;  %2310 = vmatprep.subr.bf16.mxu1 %v2636_v46 }
 0x584   :  { %2280 = vmatpush1.bf16.msra.mxu0 %v2639_v53  ;;  %2312 = vmatpush1.bf16.msra.mxu1 %v2643_v54 }
 0x585   :  { %2282 = vmatprep.subr.bf16.mxu0 %v2645_v55  ;;  %2314 = vmatprep.subr.bf16.mxu1 %v2648_v59 }
 0x588   :  { %2284 = vmatpush1.bf16.msra.mxu0 %v2651_v2  ;;  %2316 = vmatpush1.bf16.msra.mxu1 %v2655_v3 }
 0x589   :  { %2286 = vmatprep.subr.bf16.mxu0 %v2657_v4  ;;  %2318 = vmatprep.subr.bf16.mxu1 %v2660_v9 }
 0x58c   :  { %2288 = vmatpush1.bf16.msra.mxu0 %v2663_v18  ;;  %2320 = vmatpush1.bf16.msra.mxu1 %v2667_v22 }
 0x58d   :  { %2290 = vmatprep.subr.bf16.mxu0 %v2669_v23  ;;  %2322 = vmatprep.subr.bf16.mxu1 %v2675_v30 }
 0x590   :  { %2292 = vmatpush1.bf16.msra.mxu0 %v2678_v38  ;;  %2324 = vmatpush1.bf16.msra.mxu1 %v2682_v39 }
 0x591   :  { %2294 = vmatprep.subr.bf16.mxu0 %v2684_v40  ;;  %2326 = vmatprep.subr.bf16.mxu1 %v2687_v45 }
 0x594   :  { %2296 = vmatpush1.bf16.msra.mxu0 %v2690_v49  ;;  %2328 = vmatpush1.bf16.msra.mxu1 %v2694_v50 }
 0x595   :  { %2330 = vmatprep.subr.bf16.mxu0 %v2600_v6  ;;  %2362 = vmatprep.subr.bf16.mxu1 %v2602_v10 }
 0x64a   :  { %v1203_v58 = vpop.f32.mrb[10].mxu0  ;;  %v1274_v60 = vpop.f32.mrb[10].mxu1 }
 0x64b   :  { %v1205_v61 = vpop.f32.mrb[11].mxu0  ;;  %v1276_v62 = vpop.f32.mrb[11].mxu1 }
 0x64c   :  { %v1283_v63 = vcombine.low %v1203_v58, %v1205_v61  ;;  %v1284_v0 = vcombine.low %v1274_v60, %v1276_v62  ;;  %v2403_v58 = vpack.c.bf16 %v1724_v57, %v1723_v56  ;;  %v1725_v60 = vld [vmem:[%s3060_s4 + $0x40] sm:$0xff]  ;;  %v1727_v62 = vld [vmem:[%s3060_s4 + $0x50] sm:$0xff] }
 0x64e   :  { %v1291_v5 = vrot.slane %v1283_v63, %v2743_v44  ;;  %v1298_v7 = vrot.slane %v1284_v0, %v2743_v44  ;;  %v1728_v63 = vld [vmem:[%s3060_s4 + $0x58] sm:$0xff] }
 0x64f   :  { %v2409_v0 = vpack.c.bf16 %v1728_v63, %v1727_v62 }
 0x650   :  { %v1299_v8 = vcombine.low %v1291_v5, %v1298_v7  ;;  %v1729_v5 = vld [vmem:[%s3060_s4 + $0x60] sm:$0xff]  ;;  %v1730_v7 = vld [vmem:[%s3060_s4 + $0x68] sm:$0xff] }
 0x652   :  { %v1306_v52 = vrot.slane %v1299_v8, %v2743_v44  ;;  %v2412_v8 = vpack.c.bf16 %v1730_v7, %v1729_v5 }
 0x654   :  { %v1308_v13 = vadd.f32 %v1306_v52, %v1136_v12  ;;  %v1731_v52 = vld [vmem:[%s3060_s4 + $0x70] sm:$0xff]  ;;  %v1732_v12 = vld [vmem:[%s3060_s4 + $0x78] sm:$0xff] }
 0x656   :  { %v1826_v14 = vmul.f32 -1.442695, %v1308_v13  ;;  %v1316_v10 = vrot.slane %v1308_v13, 3  ;;  %v2415_v13 = vpack.c.bf16 %v1732_v12, %v1731_v52 }
 0x658   :  { %2467 = vpow2.f32 %v1826_v14 }
 0x662   :  { %v2468_v6 = vpop.eup %2467 }
 0x663   :  { %v1312_v16 = vadd.f32 1.0, %v2468_v6 }
 0x665   :  { %2469 = vrcp.f32 %v1312_v16 }
 0x666   :  { %2471 = vtanh.f32 %v1316_v10 }
 0x66f   :  { %v2470_v17 = vpop.eup %2469 }
 0x670   :  { %v1320_v21 = vrot.slane %v2470_v17, 1  ;;  %v2472_v25 = vpop.eup %2471  ;;  %v1326_v32 = vrot.slane %v2470_v17, 2 }
 0x671   :  { %v1323_v26 = vmul.f32 %v2472_v25, %v2470_v17 }
 0x672   :  { %v1322_v27 = vmul.f32 %v1320_v21, %v2912_v48  ;;  %v1722_v48 = vld [vmem:[%s3060_s4 + $0x28] sm:$0xff] }
 0x673   :  { %v2400_v51 = vpack.c.bf16 %v1722_v48, %v1721_v47 }
 0x674   :  { %v1324_v31 = vadd.f32 %v1323_v26, %v1322_v27 }
 0x676   :  { %2473 = vtanh.f32 %v1324_v31 }
 0x680   :  { %v2474_v34 = vpop.eup %2473 }
 0x681   :  { %v1328_v35 = vmul.f32 %v2474_v34, %v1326_v32  ;;  %v1524_v32 = vld [vmem:[#allocation2 + $0x7] ss:$8 sm:$0xf] }
 0x683   :  { %1396 = vmatmul.mubr.f32.vlgmr.msra.gmra.mrb[12].mxu0 %v1328_v35  ;;  %1467 = vmatmul.mubr.f32.vlgmr.msra.gmra.mrb[12].mxu1 %v1328_v35 }
 0x684   :  { %2332 = vmatpush1.bf16.msra.mxu0 %v2604_v11  ;;  %2364 = vmatpush1.bf16.msra.mxu1 %v2607_v15 }
 0x685   :  { %2334 = vmatprep.subr.bf16.mxu0 %v2611_v19  ;;  %2366 = vmatprep.subr.bf16.mxu1 %v2613_v20 }
 0x686   :  { %1589 = vmatprep.mubr.f32.mxu0 %v2542_v1  ;;  %1660 = vmatprep.mubr.f32.mxu1 %v2542_v1 }
 0x688   :  { %2336 = vmatpush1.bf16.msra.mxu0 %v2616_v24  ;;  %2368 = vmatpush1.bf16.msra.mxu1 %v2620_v28 }
 0x689   :  { %2338 = vmatprep.subr.bf16.mxu0 %v2622_v29  ;;  %2370 = vmatprep.subr.bf16.mxu1 %v2624_v33 }
 0x68c   :  { %2340 = vmatpush1.bf16.msra.mxu0 %v2627_v37  ;;  %2372 = vmatpush1.bf16.msra.mxu1 %v2631_v41 }
 0x68d   :  { %2342 = vmatprep.subr.bf16.mxu0 %v2633_v42  ;;  %2374 = vmatprep.subr.bf16.mxu1 %v2636_v46  ;;  %v1330_v42 = vld [vmem:[#allocation2 + $0x6] ss:$8 sm:$0xf] }
 0x690   :  { %2344 = vmatpush1.bf16.msra.mxu0 %v2639_v53  ;;  %2376 = vmatpush1.bf16.msra.mxu1 %v2643_v54 }
 0x691   :  { %2346 = vmatprep.subr.bf16.mxu0 %v2645_v55  ;;  %2378 = vmatprep.subr.bf16.mxu1 %v2648_v59 }
 0x694   :  { %2348 = vmatpush1.bf16.msra.mxu0 %v2651_v2  ;;  %2380 = vmatpush1.bf16.msra.mxu1 %v2655_v3 }
 0x695   :  { %2350 = vmatprep.subr.bf16.mxu0 %v2657_v4  ;;  %2382 = vmatprep.subr.bf16.mxu1 %v2660_v9 }
 0x698   :  { %2352 = vmatpush1.bf16.msra.mxu0 %v2663_v18  ;;  %2384 = vmatpush1.bf16.msra.mxu1 %v2667_v22 }
 0x699   :  { %2354 = vmatprep.subr.bf16.mxu0 %v2669_v23  ;;  %2386 = vmatprep.subr.bf16.mxu1 %v2675_v30 }
 0x69c   :  { %2356 = vmatpush1.bf16.msra.mxu0 %v2678_v38  ;;  %2388 = vmatpush1.bf16.msra.mxu1 %v2682_v39  ;;  %v1717_v39 = vld [vmem:[%s3060_s4] sm:$0xff] }
 0x69d   :  { %2358 = vmatprep.subr.bf16.mxu0 %v2684_v40  ;;  %2390 = vmatprep.subr.bf16.mxu1 %v2687_v45  ;;  %v1718_v40 = vld [vmem:[%s3060_s4 + $0x8] sm:$0xff] }
 0x69e   :  { %v2394_v45 = vpack.c.bf16 %v1718_v40, %v1717_v39 }
 0x6a0   :  { %2360 = vmatpush1.bf16.msra.mxu0 %v2690_v49  ;;  %2392 = vmatpush1.bf16.msra.mxu1 %v2694_v50  ;;  %v2545_v49 = vmov 0.0|0.0   ;;  %v1719_v50 = vld [vmem:[%s3060_s4 + $0x10] sm:$0xff] }
 0x6a1   :  { %2393 = vmatprep.subr.bf16.mxu0 %v2545_v49  ;;  %v2397_v43 = vpack.c.bf16 %v1720_v36, %v1719_v50 }
 0x756   :  { %v1397_v11 = vpop.f32.mrb[12].mxu0  ;;  %v1468_v15 = vpop.f32.mrb[12].mxu1 }
 0x757   :  { %v1399_v19 = vpop.f32.mrb[13].mxu0  ;;  %v1470_v20 = vpop.f32.mrb[13].mxu1 }
 0x758   :  { %v1477_v24 = vcombine.low %v1397_v11, %v1399_v19  ;;  %v1478_v28 = vcombine.low %v1468_v15, %v1470_v20 }
 0x75a   :  { %v1485_v29 = vrot.slane %v1477_v24, %v2743_v44  ;;  %v1492_v33 = vrot.slane %v1478_v28, %v2743_v44 }
 0x75c   :  { %v1493_v37 = vcombine.low %v1485_v29, %v1492_v33 }
 0x75e   :  { %v1500_v41 = vrot.slane %v1493_v37, %v2743_v44 }
 0x760   :  { %v1502_v46 = vadd.f32 %v1500_v41, %v1330_v42 }
 0x762   :  { %v1827_v53 = vmul.f32 -1.442695, %v1502_v46  ;;  %v1510_v59 = vrot.slane %v1502_v46, 3  ;;  %v1733_v46 = vld [vmem:[#allocation3] sm:$0x1] }
 0x764   :  { %2475 = vpow2.f32 %v1827_v53 }
 0x76e   :  { %v2476_v54 = vpop.eup %2475 }
 0x76f   :  { %v1506_v55 = vadd.f32 1.0, %v2476_v54 }
 0x771   :  { %2477 = vrcp.f32 %v1506_v55 }
 0x772   :  { %2479 = vtanh.f32 %v1510_v59 }
 0x77b   :  { %v2478_v2 = vpop.eup %2477 }
 0x77c   :  { %v1514_v3 = vrot.slane %v2478_v2, 1  ;;  %v2480_v4 = vpop.eup %2479  ;;  %v1520_v23 = vrot.slane %v2478_v2, 2 }
 0x77d   :  { %v1517_v9 = vmul.f32 %v2480_v4, %v2478_v2 }
 0x77e   :  { %v1516_v18 = vmul.f32 %v1514_v3, %v1324_v31 }
 0x780   :  { %v2988_v22 = vadd.f32 %v1517_v9, %v1516_v18 }
 0x782   :  { %2481 = vtanh.f32 %v2988_v22 }
 0x78c   :  { %v2482_v30 = vpop.eup %2481 }
 0x78d   :  { %v1522_v38 = vmul.f32 %v2482_v30, %v1520_v23 }
 0x78f   :  { %1590 = vmatmul.mubr.f32.vlgmr.msra.gmra.mrb[14].mxu0 %v1522_v38  ;;  %1661 = vmatmul.mubr.f32.vlgmr.msra.gmra.mrb[14].mxu1 %v1522_v38 }
 0x790   :  { %2395 = vmatpush3.bf16.msra.mxu0 %v2394_v45  ;;  %1878 = vmatprep.mubr.msk.f32.mxu0 %vm2546_vm0, %v2542_v1  ;;  %v1726_v1 = vld [vmem:[%s3060_s4 + $0x48] sm:$0xff]  ;;  %s2547_s4 = smov [#allocation7]  }
 0x791   :  { %2396 = vmatprep.subr.bf16.mxu0 %v2545_v49  ;;  %v2406_v61 = vpack.c.bf16 %v1726_v1, %v1725_v60  ;;  %s1812_s17 = sshll.u32 %s2547_s4, 4  ;;  %s1813_s17 = int_to_ptr.vmem [resolvable:$true] %s1812_s17 }
 0x792   :  { %s2513_s18 = scalar_lea.vmem %s1813_s17, 16  ;;  %s2517_s19 = scalar_lea.vmem %s1813_s17, 32 }
 0x793   :  { %p2514_p8 = scmp.ne.s32.totalorder %s1813_s17, %s2513_s18  ;;  %p2518_p9 = scmp.lt.s32.totalorder %s1813_s17, %s1813_s17 }
 0x794   :  { %2398 = vmatpush3.bf16.msra.mxu0 %v2397_v43  ;;  %p2519_p10 = scmp.lt.s32.totalorder %s2517_s19, %s2513_s18 }
 0x795   :  { %2399 = vmatprep.subr.bf16.mxu0 %v2545_v49 }
 0x796   :  { %p2520_p11 = por %p2519_p10, %p2518_p9 }
 0x798   :  { %2401 = vmatpush3.bf16.msra.mxu0 %v2400_v51  ;;  %p2521_p12 = pnand %p2520_p11, %p2514_p8 }
 0x799   :  { %2402 = vmatprep.subr.bf16.mxu0 %v2545_v49 }
 0x79c   :  { %2404 = vmatpush3.bf16.msra.mxu0 %v2403_v58 }
 0x79d   :  { %2405 = vmatprep.subr.bf16.mxu0 %v2545_v49 }
 0x7a0   :  { %2407 = vmatpush3.bf16.msra.mxu0 %v2406_v61 }
 0x7a1   :  { %2408 = vmatprep.subr.bf16.mxu0 %v2545_v49 }
 0x7a4   :  { %2410 = vmatpush3.bf16.msra.mxu0 %v2409_v0 }
 0x7a5   :  { %2411 = vmatprep.subr.bf16.mxu0 %v2545_v49 }
 0x7a8   :  { %2413 = vmatpush3.bf16.msra.mxu0 %v2412_v8 }
 0x7a9   :  { %2414 = vmatprep.subr.bf16.mxu0 %v2545_v49 }
 0x7ac   :  { %2416 = vmatpush3.bf16.msra.mxu0 %v2415_v13 }
 0x862   :  { %v1591_v14 = vpop.f32.mrb[14].mxu0  ;;  %v1662_v6 = vpop.f32.mrb[14].mxu1 }
 0x863   :  { %v1593_v16 = vpop.f32.mrb[15].mxu0  ;;  %v1664_v10 = vpop.f32.mrb[15].mxu1 }
 0x864   :  { %v1671_v17 = vcombine.low %v1591_v14, %v1593_v16  ;;  %v1672_v21 = vcombine.low %v1662_v6, %v1664_v10 }
 0x866   :  { %v1679_v25 = vrot.slane %v1671_v17, %v2743_v44  ;;  %v1686_v26 = vrot.slane %v1672_v21, %v2743_v44 }
 0x868   :  { %v1687_v27 = vcombine.low %v1679_v25, %v1686_v26 }
 0x86a   :  { %v1694_v31 = vrot.slane %v1687_v27, %v2743_v44 }
 0x86c   :  { %v1696_v34 = vadd.f32 %v1694_v31, %v1524_v32 }
 0x86e   :  { %v1828_v35 = vmul.f32 -1.442695, %v1696_v34  ;;  %v1704_v19 = vrot.slane %v1696_v34, 3 }
 0x870   :  { %2483 = vpow2.f32 %v1828_v35 }
 0x87a   :  { %v2484_v11 = vpop.eup %2483 }
 0x87b   :  { %v1700_v15 = vadd.f32 1.0, %v2484_v11 }
 0x87d   :  { %2485 = vrcp.f32 %v1700_v15 }
 0x87e   :  { %2487 = vtanh.f32 %v1704_v19 }
 0x887   :  { %v2486_v20 = vpop.eup %2485 }
 0x888   :  { %v1708_v24 = vrot.slane %v2486_v20, 1  ;;  %v2488_v28 = vpop.eup %2487  ;;  %v1714_v41 = vrot.slane %v2486_v20, 2 }
 0x889   :  { %v1711_v33 = vmul.f32 %v2488_v28, %v2486_v20 }
 0x88a   :  { %v1710_v29 = vmul.f32 %v1708_v24, %v2988_v22 }
 0x88c   :  { %v1712_v37 = vadd.f32 %v1711_v33, %v1710_v29 }
 0x88e   :  { %2489 = vtanh.f32 %v1712_v37 }
 0x898   :  { %v2490_v42 = vpop.eup %2489 }
 0x899   :  { %v1716_v44 = vmul.f32 %v2490_v42, %v1714_v41 }
 0x89b   :  { %1879 = vmatmul.mubr.f32.vlgmr.msra.gmra.mrb[16].mxu0 %v1716_v44 }
 0x96e   :  { %v1800_v53 = vpop.f32.mrb[16].mxu0 }
 0x96f   :  { %v1801_v54 = vadd.f32 %v1800_v53, %v1733_v46  ;;  %v1880_v55 = vpop.f32.mrb[17].mxu0 }
 0x971   :  { %1805 = vst.msk [vmem:[#allocation7] sm:$0x1] %vm1804_vm1, %v1801_v54 }
 0x972   :  { %2524 = shalt.err (!%p2521_p12)
}
 0x973   :  { %s2525_s22 = scalar_lea.hbm %s3062_s6, 16 }
 0x974   :  { %p2526_p13 = scmp.ne.s32.totalorder %s3062_s6, %s2525_s22  ;;  %p2529_p0 = scmp.lt.u32.totalorder %s2525_s22, %s3062_s6 }
 0x976   :  { %p2531_p1 = pnand %p2529_p0, %p2526_p13 }
 0x978   :  { %2534 = shalt.err (!%p2531_p1)
}
 0x979   :  { %1815 = dma.vmem_to_hbm [thread:$0]  %s1813_s17, 16, %s3062_s6, [#allocation6]  }
 0x97a   :  { %2537 = dma.done.wait [#allocation6], 16  }
 0x97b   :  { %2538 = vsyncadd [#allocation6], 4294967280 }
 0x97c   :  { %1819 = vsyncpa [#allocation5], 1 }
 0x97d   :  { %1820 = vsyncpa [#allocation6], 1 }

</bundles_post_ra>
